<compile_context>
chip_gen: v5e
topology: v5e:2x2
jax: 0.10.0
libtpu: 0.0.40
codegen_flags: <defaults>
</compile_context>

<pallas_src>
import functools

import jax
import jax.numpy as jnp
from jax.experimental import pallas as pl
from jax.experimental.pallas import tpu as pltpu


def _round_up(x, m):
    return (x + m - 1) // m * m


def _pick_m_tiles(M, cap=1024):
    """Pad M only to a multiple of 128; pick the largest lane tile <= cap that
    divides the padded M and (when possible) yields >= 2 tiles so both v7x
    TensorCores get work on the 'parallel' grid axis."""
    Mp = _round_up(M, 128)
    if Mp <= 128:
        return Mp, Mp
    tn = 128
    t = 128
    limit = min(cap, Mp // 2)
    while t <= limit:
        if Mp % t == 0:
            tn = t
        t += 128
    return tn, Mp


def _pick_row_tiles(R, cap=256):
    """Row (sublane) tile: multiple of 8 dividing R, >= 2 tiles when possible."""
    if R < 16 or R % 8 != 0:
        return R
    tb = None
    t = 8
    limit = min(cap, R // 2)
    while t <= limit:
        if R % t == 0:
            tb = t
        t += 8
    return tb if tb is not None else R


# --------------------------------------------------------------------------- #
# Pallas kernels
# --------------------------------------------------------------------------- #
def _matmul_affine_kernel(w_ref, a_ref, scale_ref, shift_ref, o_ref, *, relu):
    """Single-K-block conv matmul: o = act((w @ a) * scale + shift)."""
    y = jnp.dot(w_ref[...], a_ref[...], preferred_element_type=jnp.float32)
    y = y * scale_ref[...] + shift_ref[...]          # folded-BN affine in f32
    if relu:
        y = jnp.maximum(y, 0.0)
    o_ref[...] = y.astype(o_ref.dtype)


def matmul_affine(w2, a, scale, shift, *, relu, out_dtype=jnp.bfloat16):
    """o[c, m] = act((sum_k w2[c, k] * a[k, m]) * scale[c] + shift[c]).

    Channel-major: the long flattened-pixel axis M is the lane axis, the small
    channel axis is the row axis.  K is a single full-extent block (every conv
    in this model has K <= 1024), so there is no K grid axis and no VMEM
    accumulator — just dot -> affine -> store, tiled over M ('parallel').
    """
    Cout, K = w2.shape
    K2, M = a.shape
    assert K == K2
    # TODO(synk): re-introduce a K-tiled accumulator path if K ever exceeds 1024.
    assert K <= 1024, "matmul_affine: K-tiled path not needed for this model"

    tn, Mp = _pick_m_tiles(M)
    a_p = a if Mp == M else jnp.pad(a, ((0, 0), (0, Mp - M)))

    out = pl.pallas_call(
        functools.partial(_matmul_affine_kernel, relu=relu),
        out_shape=jax.ShapeDtypeStruct((Cout, Mp), out_dtype),
        grid=(Mp // tn,),
        in_specs=[
            pl.BlockSpec((Cout, K), lambda m: (0, 0)),
            pl.BlockSpec((K, tn), lambda m: (0, m)),
            pl.BlockSpec((Cout, 1), lambda m: (0, 0)),
            pl.BlockSpec((Cout, 1), lambda m: (0, 0)),
        ],
        out_specs=pl.BlockSpec((Cout, tn), lambda m: (0, m)),
        compiler_params=pltpu.CompilerParams(
            dimension_semantics=("parallel",),
            vmem_limit_bytes=32 * 1024 * 1024),
    )(w2.astype(jnp.bfloat16), a_p.astype(jnp.bfloat16),
      scale.reshape(Cout, 1).astype(jnp.float32),
      shift.reshape(Cout, 1).astype(jnp.float32))
    return out[:, :M] if Mp != M else out


def _gap_conv_kernel(x_ref, w_ref, scale_ref, shift_ref, o_ref, acc_ref, *,
                     inv_hw):
    """ASPP image-pooling branch: blocked GAP + 1x1 conv + BN + ReLU, fused."""
    @pl.when(pl.program_id(0) == 0)
    def _init():
        acc_ref[...] = jnp.zeros_like(acc_ref)

    acc_ref[...] += jnp.sum(x_ref[...].astype(jnp.float32), axis=-1)  # (Cin, N)

    @pl.when(pl.program_id(0) == pl.num_programs(0) - 1)
    def _finalize():
        pooled = acc_ref[...] * inv_hw                                 # (Cin, N)
        y = jnp.dot(w_ref[...], pooled, preferred_element_type=jnp.float32)
        y = jnp.maximum(y * scale_ref[...] + shift_ref[...], 0.0)
        o_ref[...] = y.astype(o_ref.dtype)


def global_pool_branch(x, params, out_dtype=jnp.bfloat16):
    """x: (Cin, N, H, W) -> (Cout, N); spatial reduction blocked over H*W."""
    w, scale, shift = params                       # w: (1, 1, Cin, Cout)
    Cin, N, H, W = x.shape
    Cout = w.shape[3]
    HW = H * W
    w2 = jnp.transpose(w.reshape(Cin, Cout))       # (Cout, Cin), tiny

    xf = x.reshape(Cin, N, HW)
    if HW <= 2048:                                 # single full-extent block
        thw, HWp = HW, HW
    else:                                          # block the reduction (VMEM)
        thw = 2048
        HWp = _round_up(HW, thw)
        xf = jnp.pad(xf, ((0, 0), (0, 0), (0, HWp - HW)))   # zeros: sum-safe

    return pl.pallas_call(
        functools.partial(_gap_conv_kernel, inv_hw=1.0 / HW),
        out_shape=jax.ShapeDtypeStruct((Cout, N), out_dtype),
        grid=(HWp // thw,),
        in_specs=[
            pl.BlockSpec((Cin, N, thw), lambda s: (0, 0, s)),
            pl.BlockSpec((Cout, Cin), lambda s: (0, 0)),
            pl.BlockSpec((Cout, 1), lambda s: (0, 0)),
            pl.BlockSpec((Cout, 1), lambda s: (0, 0)),
        ],
        out_specs=pl.BlockSpec((Cout, N), lambda s: (0, 0)),
        scratch_shapes=[pltpu.VMEM((Cin, N), jnp.float32)],
        compiler_params=pltpu.CompilerParams(
            dimension_semantics=("arbitrary",),
            vmem_limit_bytes=32 * 1024 * 1024),
    )(xf.astype(jnp.bfloat16), w2.astype(jnp.float32),
      scale.reshape(Cout, 1).astype(jnp.float32),
      shift.reshape(Cout, 1).astype(jnp.float32))


def _aspp_proj_kernel(b1, b2, b3, b4, w_ref, pooled_ref, sel_ref,
                      scale_ref, shift_ref, o_ref):
    """Fused ASPP projection: 1x1 conv over the *virtual* concat of the four
    spatial branches plus the image-pooling branch, + BN + ReLU.

    The pooled branch (constant per image) is folded in as a per-image bias:
    (w5 @ pooled) @ sel, where sel is a tiny {0,1} image-selector matrix —
    so neither the 80xM concat nor the broadcast (C,N,H,W) pooled map ever
    touches HBM.
    """
    acc = jnp.dot(w_ref[0], b1[...], preferred_element_type=jnp.float32)
    acc += jnp.dot(w_ref[1], b2[...], preferred_element_type=jnp.float32)
    acc += jnp.dot(w_ref[2], b3[...], preferred_element_type=jnp.float32)
    acc += jnp.dot(w_ref[3], b4[...], preferred_element_type=jnp.float32)
    pb = jnp.dot(w_ref[4], pooled_ref[...],
                 preferred_element_type=jnp.float32)          # (Cout, N)
    acc += jnp.dot(pb.astype(jnp.bfloat16), sel_ref[...],
                   preferred_element_type=jnp.float32)        # per-image bias
    y = jnp.maximum(acc * scale_ref[...] + shift_ref[...], 0.0)
    o_ref[...] = y.astype(o_ref.dtype)


def aspp_project(branches, pooled, params, out_dtype=jnp.bfloat16):
    """branches: 4x (Cb, N, HO, WO); pooled: (Cb, N) -> (Cout, N, HO, WO)."""
    w, scale, shift = params                       # w: (1, 1, 5*Cb, Cout)
    Cb, N, HO, WO = branches[0].shape
    Cout = w.shape[3]
    nb = len(branches) + 1                         # 4 spatial + pooled
    M = N * HO * WO
    HW = HO * WO

    ws = jnp.transpose(w.reshape(nb, Cb, Cout), (0, 2, 1))     # (5, Cout, Cb)

    tn, Mp = _pick_m_tiles(M)

    def prep(b):
        b2 = b.reshape(Cb, M)
        return b2 if Mp == M else jnp.pad(b2, ((0, 0), (0, Mp - M)))

    bs = [prep(b).astype(jnp.bfloat16) for b in branches]
    sel = jnp.repeat(jnp.eye(N, dtype=jnp.float32), HW, axis=1)  # (N, M)
    if Mp != M:
        sel = jnp.pad(sel, ((0, 0), (0, Mp - M)))

    out = pl.pallas_call(
        _aspp_proj_kernel,
        out_shape=jax.ShapeDtypeStruct((Cout, Mp), out_dtype),
        grid=(Mp // tn,),
        in_specs=[pl.BlockSpec((Cb, tn), lambda m: (0, m))] * 4 + [
            pl.BlockSpec((nb, Cout, Cb), lambda m: (0, 0, 0)),
            pl.BlockSpec((Cb, N), lambda m: (0, 0)),
            pl.BlockSpec((N, tn), lambda m: (0, m)),
            pl.BlockSpec((Cout, 1), lambda m: (0, 0)),
            pl.BlockSpec((Cout, 1), lambda m: (0, 0)),
        ],
        out_specs=pl.BlockSpec((Cout, tn), lambda m: (0, m)),
        compiler_params=pltpu.CompilerParams(
            dimension_semantics=("parallel",),
            vmem_limit_bytes=32 * 1024 * 1024),
    )(*bs, ws.astype(jnp.bfloat16), pooled.astype(jnp.bfloat16),
      sel.astype(jnp.bfloat16),
      scale.reshape(Cout, 1).astype(jnp.float32),
      shift.reshape(Cout, 1).astype(jnp.float32))
    out = out[:, :M] if Mp != M else out
    return out.reshape(Cout, N, HO, WO)


def _bilinear_kernel(m2d_ref, x_ref, o_ref):
    """Lane-dense bilinear resize: out(rows, OH*OW) = x(rows, H*W) @ M2d^T."""
    o_ref[...] = jnp.dot(x_ref[...], m2d_ref[...],
                         preferred_element_type=jnp.float32).astype(o_ref.dtype)


def _bilinear_matrix(out_size, in_size):
    """1-D interpolation matrix for bilinear resize with align_corners=True."""
    if in_size == 1:
        return jnp.ones((out_size, 1), jnp.float32)
    if out_size == 1:
        return jnp.zeros((1, in_size), jnp.float32).at[0, 0].set(1.0)
    scale = (in_size - 1) / (out_size - 1)
    pos = jnp.arange(out_size, dtype=jnp.float32) * scale
    lo = jnp.clip(jnp.floor(pos).astype(jnp.int32), 0, in_size - 2)
    frac = pos - lo.astype(jnp.float32)
    m = jnp.zeros((out_size, in_size), jnp.float32)
    m = m.at[jnp.arange(out_size), lo].add(1.0 - frac)
    m = m.at[jnp.arange(out_size), lo + 1].add(frac)
    return m


def bilinear_upsample(x, out_h, out_w, out_dtype=None):
    """F.interpolate(mode='bilinear', align_corners=True) for x: (C, N, H, W).

    For the small source maps in this model (H*W <= 1024) the 2-D interpolation
    matrix kron(mh, mw)^T (H*W, OH*OW) is precomputed and the resize is a single
    lane-dense bf16 MXU matmul per row block: (tb, H*W) @ (H*W, OH*OW).
    """
    C, N, H, W = x.shape
    out_dtype = out_dtype or x.dtype
    HW, OHW = H * W, out_h * out_w
    mh = _bilinear_matrix(out_h, H)                    # (OH, H)
    mw = _bilinear_matrix(out_w, W)                    # (OW, W)

    if HW > 1024:
        # TODO(synk): large source maps need a two-stage (W then H) Pallas path;
        # fall back to XLA for them (never hit at this model's shapes).
        y = jnp.einsum('oh,cnhw,pw->cnop', mh, x.astype(jnp.float32), mw)
        return y.astype(out_dtype)

    m2d = (mh[:, None, :, None] * mw[None, :, None, :]).reshape(OHW, HW)
    m2dt = jnp.transpose(m2d).astype(jnp.bfloat16)     # (H*W, OH*OW)

    CN = C * N
    xf = x.reshape(CN, HW).astype(jnp.bfloat16)
    tb = _pick_row_tiles(CN)

    out = pl.pallas_call(
        _bilinear_kernel,
        out_shape=jax.ShapeDtypeStruct((CN, OHW), out_dtype),
        grid=(CN // tb,),
        in_specs=[
            pl.BlockSpec((HW, OHW), lambda i: (0, 0)),
            pl.BlockSpec((tb, HW), lambda i: (i, 0)),
        ],
        out_specs=pl.BlockSpec((tb, OHW), lambda i: (i, 0)),
        compiler_params=pltpu.CompilerParams(
            dimension_semantics=("parallel",),
            vmem_limit_bytes=32 * 1024 * 1024),
    )(m2dt, xf)
    return out.reshape(C, N, out_h, out_w)


# --------------------------------------------------------------------------- #
# JAX glue: channel-major im2col + conv wrapper
# --------------------------------------------------------------------------- #
def _im2col_cf(x, kh, kw, stride, dilation, padding, k_pad_rows=0):
    """x: (C, N, H, W) -> (kh*kw*C + k_pad_rows, N*HO*WO) patch matrix.

    `k_pad_rows` zero taps are appended inside the (already required) concat so
    the bf16 contraction dim is a multiple of 16 at no extra HBM copy.
    """
    C, N, H, W = x.shape
    xp = jnp.pad(x, ((0, 0), (0, 0), (padding, padding), (padding, padding)))
    HO = (H + 2 * padding - dilation * (kh - 1) - 1) // stride + 1
    WO = (W + 2 * padding - dilation * (kw - 1) - 1) // stride + 1
    cols = []
    for i in range(kh):
        for j in range(kw):
            h0, w0 = i * dilation, j * dilation
            cols.append(xp[:, :, h0:h0 + (HO - 1) * stride + 1:stride,
                              w0:w0 + (WO - 1) * stride + 1:stride])
    if k_pad_rows:
        cols.append(jnp.zeros((k_pad_rows, N, HO, WO), x.dtype))
    a = jnp.concatenate(cols, axis=0)                  # (K + pad, N, HO, WO)
    return a.reshape(kh * kw * C + k_pad_rows, N * HO * WO), (N, HO, WO)


def conv_bn_act(x, params, stride=1, dilation=1, padding=0, relu=True,
                out_dtype=jnp.bfloat16):
    """Conv2d (+ folded eval-mode BatchNorm affine, + optional ReLU)."""
    w, scale, shift = params                           # w: (KH, KW, Cin, Cout)
    KH, KW, Cin, Cout = w.shape
    K = KH * KW * Cin
    Kp = _round_up(K, 16)                              # bf16 sublane packing
    w2 = jnp.transpose(w, (3, 0, 1, 2)).reshape(Cout, K)
    if Kp != K:
        w2 = jnp.pad(w2, ((0, 0), (0, Kp - K)))

    if KH == 1 and KW == 1 and stride == 1 and dilation == 1 and padding == 0:
        _, N, H, W = x.shape
        a = x.reshape(Cin, N * H * W)                  # no patch matrix needed
        if Kp != K:
            a = jnp.pad(a, ((0, Kp - K), (0, 0)))
        dims = (N, H, W)
    else:
        a, dims = _im2col_cf(x, KH, KW, stride, dilation, padding,
                             k_pad_rows=Kp - K)
    N, HO, WO = dims
    y = matmul_affine(w2, a, scale, shift, relu=relu, out_dtype=out_dtype)
    return y.reshape(Cout, N, HO, WO)


# --------------------------------------------------------------------------- #
# Deterministic parameter construction
# --------------------------------------------------------------------------- #
def _conv_bn_params(key, kh, kw, cin, cout, eps=1e-5):
    k_w, k_g = jax.random.split(key)
    fan_in = kh * kw * cin
    w = jax.random.normal(k_w, (kh, kw, cin, cout), jnp.float32) / jnp.sqrt(fan_in)
    gamma = 1.0 + 0.1 * jax.random.normal(k_g, (cout,), jnp.float32)
    beta = jnp.zeros((cout,), jnp.float32)
    running_mean = jnp.zeros((cout,), jnp.float32)
    running_var = jnp.ones((cout,), jnp.float32)
    # fold eval-mode BatchNorm into a per-channel affine
    scale = gamma / jnp.sqrt(running_var + eps)
    shift = beta - running_mean * scale
    return (w, scale, shift)


def _conv_bias_params(key, kh, kw, cin, cout):
    k_w, k_b = jax.random.split(key)
    fan_in = kh * kw * cin
    w = jax.random.normal(k_w, (kh, kw, cin, cout), jnp.float32) / jnp.sqrt(fan_in)
    b = 0.01 * jax.random.normal(k_b, (cout,), jnp.float32)
    return (w, jnp.ones((cout,), jnp.float32), b)


def init_deeplab_params(key, num_classes=5, in_ch=3):
    ks = jax.random.split(key, 13)
    p = {}
    # --- compact synthetic backbone (stride-8 feature + stride-4 low-level feat)
    p['b1'] = _conv_bn_params(ks[0], 3, 3, in_ch, 8)
    p['b2'] = _conv_bn_params(ks[1], 3, 3, 8, 16)
    p['b3'] = _conv_bn_params(ks[2], 3, 3, 16, 32)
    # --- ASPP: 1x1 + three atrous 3x3 branches + image pooling branch + projection
    p['a1'] = _conv_bn_params(ks[3], 1, 1, 32, 16)
    p['a2'] = _conv_bn_params(ks[4], 3, 3, 32, 16)
    p['a3'] = _conv_bn_params(ks[5], 3, 3, 32, 16)
    p['a4'] = _conv_bn_params(ks[6], 3, 3, 32, 16)
    p['a_pool'] = _conv_bn_params(ks[7], 1, 1, 32, 16)
    p['a_proj'] = _conv_bn_params(ks[8], 1, 1, 5 * 16, 16)
    # --- decoder
    p['d_low'] = _conv_bn_params(ks[9], 1, 1, 16, 8)
    p['d1'] = _conv_bn_params(ks[10], 3, 3, 16 + 8, 16)
    p['d2'] = _conv_bn_params(ks[11], 3, 3, 16, 16)
    p['d_cls'] = _conv_bias_params(ks[12], 1, 1, 16, num_classes)
    return p


# --------------------------------------------------------------------------- #
# DeepLab forward
# --------------------------------------------------------------------------- #
def deeplab_forward(params, x_nchw):
    # NCHW (PyTorch) -> channel-major (C, N, H, W); bf16 activations, f32 logits
    x = jnp.transpose(x_nchw, (1, 0, 2, 3)).astype(jnp.bfloat16)
    _, N, H, W = x.shape

    # backbone: x, low_level_feat = backbone(input)
    f1 = conv_bn_act(x, params['b1'], stride=2, padding=1)        # stride 2
    low = conv_bn_act(f1, params['b2'], stride=2, padding=1)      # stride 4 (low-level)
    hi = conv_bn_act(low, params['b3'], stride=2, padding=1)      # stride 8 (high-level)

    # ASPP: x = aspp(x)  — concat & pooled-branch broadcast fused away
    br1 = conv_bn_act(hi, params['a1'])
    br2 = conv_bn_act(hi, params['a2'], dilation=2, padding=2)
    br3 = conv_bn_act(hi, params['a3'], dilation=4, padding=4)
    br4 = conv_bn_act(hi, params['a4'], dilation=8, padding=8)
    pooled = global_pool_branch(hi, params['a_pool'])             # (16, N) fused GAP+1x1
    xa = aspp_project([br1, br2, br3, br4], pooled, params['a_proj'])
    # TODO(synk): ASPP/decoder Dropout layers are identity at inference and are omitted.

    # decoder: x = decoder(x, low_level_feat)
    low_p = conv_bn_act(low, params['d_low'])
    xu = bilinear_upsample(xa, low_p.shape[2], low_p.shape[3])
    dc = jnp.concatenate([xu, low_p], axis=0)
    d = conv_bn_act(dc, params['d1'], padding=1)
    d = conv_bn_act(d, params['d2'], padding=1)
    logits = conv_bn_act(d, params['d_cls'], relu=False, out_dtype=jnp.float32)

    # x = F.interpolate(x, size=input.size()[2:], mode='bilinear', align_corners=True)
    out = bilinear_upsample(logits, H, W, out_dtype=jnp.float32)  # (C, N, H, W)
    return jnp.transpose(out, (1, 0, 2, 3))                       # back to NCHW


# --------------------------------------------------------------------------- #
if __name__ == "__main__":
    key = jax.random.PRNGKey(0)
    k_params, k_x = jax.random.split(key)
    num_classes = 5
    params = init_deeplab_params(k_params, num_classes=num_classes, in_ch=3)
    x = jax.random.normal(k_x, (2, 3, 32, 32), jnp.float32)       # NCHW like PyTorch

    fwd = jax.jit(deeplab_forward)
    out = jax.block_until_ready(fwd(params, x))

    assert out.shape == (2, num_classes, 32, 32), out.shape
    assert bool(jnp.all(jnp.isfinite(out)))
    print("KERNEL_OK")
</pallas_src>

<mosaic_0001>
module attributes {stable_mosaic.version = 11 : i64} {
  func.func @_matmul_affine_kernel(%arg0: i32, %arg1: memref<8x32xbf16, #tpu.memory_space<vmem>>, %arg2: memref<32x256xbf16, #tpu.memory_space<vmem>>, %arg3: memref<8x1xf32, #tpu.memory_space<vmem>>, %arg4: memref<8x1xf32, #tpu.memory_space<vmem>>, %arg5: memref<8x256xbf16, #tpu.memory_space<vmem>>) attributes {dimension_semantics = [#tpu.dimension_semantics<parallel>], iteration_bounds = array<i64: 2>, scalar_prefetch = 0 : i64, scratch_operands = 0 : i64, tpu.core_type = #tpu.core_type<tc>, window_params = [{pipeline_mode = #tpu.pipeline_mode<synchronous>, transform_indices = @transform_0, window_bounds = array<i64: 8, 32>}, {transform_indices = @transform_1, window_bounds = array<i64: 32, 256>}, {pipeline_mode = #tpu.pipeline_mode<synchronous>, transform_indices = @transform_2, window_bounds = array<i64: 8, 1>}, {pipeline_mode = #tpu.pipeline_mode<synchronous>, transform_indices = @transform_3, window_bounds = array<i64: 8, 1>}, {transform_indices = @transform_4, window_bounds = array<i64: 8, 256>}]} {
    %c0 = arith.constant 0 : index
    %c0_0 = arith.constant 0 : index
    %0 = vector.load %arg1[%c0, %c0_0] : memref<8x32xbf16, #tpu.memory_space<vmem>>, vector<8x32xbf16>
    %c0_1 = arith.constant 0 : index
    %c0_2 = arith.constant 0 : index
    %1 = vector.load %arg2[%c0_1, %c0_2] : memref<32x256xbf16, #tpu.memory_space<vmem>>, vector<32x256xbf16>
    %cst = arith.constant dense<0.000000e+00> : vector<8x256xf32>
    %2 = tpu.matmul %0, %1, %cst {dimension_numbers = #tpu.dot_dimension_numbers<[1], [0], [0], [1], [0, 0, 1, 1], [], []>} : vector<8x32xbf16>, vector<32x256xbf16>, vector<8x256xf32> -> vector<8x256xf32>
    %c0_3 = arith.constant 0 : index
    %c0_4 = arith.constant 0 : index
    %3 = vector.load %arg3[%c0_3, %c0_4] : memref<8x1xf32, #tpu.memory_space<vmem>>, vector<8x1xf32>
    %4 = vector.broadcast %3 : vector<8x1xf32> to vector<8x256xf32>
    %5 = arith.mulf %2, %4 : vector<8x256xf32>
    %c0_5 = arith.constant 0 : index
    %c0_6 = arith.constant 0 : index
    %6 = vector.load %arg4[%c0_5, %c0_6] : memref<8x1xf32, #tpu.memory_space<vmem>>, vector<8x1xf32>
    %7 = vector.broadcast %6 : vector<8x1xf32> to vector<8x256xf32>
    %8 = arith.addf %5, %7 : vector<8x256xf32>
    %cst_7 = arith.constant 0.000000e+00 : f32
    %9 = vector.broadcast %cst_7 : f32 to vector<8x256xf32>
    %10 = arith.maximumf %8, %9 : vector<8x256xf32>
    %11 = arith.truncf %10 : vector<8x256xf32> to vector<8x256xbf16>
    %c0_8 = arith.constant 0 : index
    %c0_9 = arith.constant 0 : index
    %12 = vector.load %arg5[%c0_8, %c0_9] : memref<8x256xbf16, #tpu.memory_space<vmem>>, vector<8x256xbf16>
    tpu.vector_store %arg5[%c0_8, %c0_9], %11 {strides = array<i32>} : memref<8x256xbf16, #tpu.memory_space<vmem>>, vector<8x256xbf16>,
    return
  }
  func.func @transform_0(%arg0: i32) -> (i32, i32) {
    %c0_i32 = arith.constant 0 : i32
    %c0_i32_0 = arith.constant 0 : i32
    %c0_i32_1 = arith.constant 0 : i32
    return %c0_i32, %c0_i32_0 : i32, i32
  }
  func.func @transform_1(%arg0: i32) -> (i32, i32) {
    %c0_i32 = arith.constant 0 : i32
    %c0_i32_0 = arith.constant 0 : i32
    return %c0_i32, %arg0 : i32, i32
  }
  func.func @transform_2(%arg0: i32) -> (i32, i32) {
    %c0_i32 = arith.constant 0 : i32
    %c0_i32_0 = arith.constant 0 : i32
    %c0_i32_1 = arith.constant 0 : i32
    return %c0_i32, %c0_i32_0 : i32, i32
  }
  func.func @transform_3(%arg0: i32) -> (i32, i32) {
    %c0_i32 = arith.constant 0 : i32
    %c0_i32_0 = arith.constant 0 : i32
    %c0_i32_1 = arith.constant 0 : i32
    return %c0_i32, %c0_i32_0 : i32, i32
  }
  func.func @transform_4(%arg0: i32) -> (i32, i32) {
    %c0_i32 = arith.constant 0 : i32
    %c0_i32_0 = arith.constant 0 : i32
    return %c0_i32, %arg0 : i32, i32
  }
}

module attributes {stable_mosaic.version = 11 : i64} {
  func.func @_matmul_affine_kernel(%arg0: i32, %arg1: memref<16x80xbf16, #tpu.memory_space<vmem>>, %arg2: memref<80x128xbf16, #tpu.memory_space<vmem>>, %arg3: memref<16x1xf32, #tpu.memory_space<vmem>>, %arg4: memref<16x1xf32, #tpu.memory_space<vmem>>, %arg5: memref<16x128xbf16, #tpu.memory_space<vmem>>) attributes {dimension_semantics = [#tpu.dimension_semantics<parallel>], iteration_bounds = array<i64: 1>, scalar_prefetch = 0 : i64, scratch_operands = 0 : i64, tpu.core_type = #tpu.core_type<tc>, window_params = [{pipeline_mode = #tpu.pipeline_mode<synchronous>, transform_indices = @transform_0, window_bounds = array<i64: 16, 80>}, {transform_indices = @transform_1, window_bounds = array<i64: 80, 128>}, {pipeline_mode = #tpu.pipeline_mode<synchronous>, transform_indices = @transform_2, window_bounds = array<i64: 16, 1>}, {pipeline_mode = #tpu.pipeline_mode<synchronous>, transform_indices = @transform_3, window_bounds = array<i64: 16, 1>}, {transform_indices = @transform_4, window_bounds = array<i64: 16, 128>}]} {
    %c0 = arith.constant 0 : index
    %c0_0 = arith.constant 0 : index
    %0 = vector.load %arg1[%c0, %c0_0] : memref<16x80xbf16, #tpu.memory_space<vmem>>, vector<16x80xbf16>
    %c0_1 = arith.constant 0 : index
    %c0_2 = arith.constant 0 : index
    %1 = vector.load %arg2[%c0_1, %c0_2] : memref<80x128xbf16, #tpu.memory_space<vmem>>, vector<80x128xbf16>
    %cst = arith.constant dense<0.000000e+00> : vector<16x128xf32>
    %2 = tpu.matmul %0, %1, %cst {dimension_numbers = #tpu.dot_dimension_numbers<[1], [0], [0], [1], [0, 0, 1, 1], [], []>} : vector<16x80xbf16>, vector<80x128xbf16>, vector<16x128xf32> -> vector<16x128xf32>
    %c0_3 = arith.constant 0 : index
    %c0_4 = arith.constant 0 : index
    %3 = vector.load %arg3[%c0_3, %c0_4] : memref<16x1xf32, #tpu.memory_space<vmem>>, vector<16x1xf32>
    %4 = vector.broadcast %3 : vector<16x1xf32> to vector<16x128xf32>
    %5 = arith.mulf %2, %4 : vector<16x128xf32>
    %c0_5 = arith.constant 0 : index
    %c0_6 = arith.constant 0 : index
    %6 = vector.load %arg4[%c0_5, %c0_6] : memref<16x1xf32, #tpu.memory_space<vmem>>, vector<16x1xf32>
    %7 = vector.broadcast %6 : vector<16x1xf32> to vector<16x128xf32>
    %8 = arith.addf %5, %7 : vector<16x128xf32>
    %cst_7 = arith.constant 0.000000e+00 : f32
    %9 = vector.broadcast %cst_7 : f32 to vector<16x128xf32>
    %10 = arith.maximumf %8, %9 : vector<16x128xf32>
    %11 = arith.truncf %10 : vector<16x128xf32> to vector<16x128xbf16>
    %c0_8 = arith.constant 0 : index
    %c0_9 = arith.constant 0 : index
    %12 = vector.load %arg5[%c0_8, %c0_9] : memref<16x128xbf16, #tpu.memory_space<vmem>>, vector<16x128xbf16>
    tpu.vector_store %arg5[%c0_8, %c0_9], %11 {strides = array<i32>} : memref<16x128xbf16, #tpu.memory_space<vmem>>, vector<16x128xbf16>,
    return
  }
  func.func @transform_0(%arg0: i32) -> (i32, i32) {
    %c0_i32 = arith.constant 0 : i32
    %c0_i32_0 = arith.constant 0 : i32
    %c0_i32_1 = arith.constant 0 : i32
    return %c0_i32, %c0_i32_0 : i32, i32
  }
  func.func @transform_1(%arg0: i32) -> (i32, i32) {
    %c0_i32 = arith.constant 0 : i32
    %c0_i32_0 = arith.constant 0 : i32
    return %c0_i32, %arg0 : i32, i32
  }
  func.func @transform_2(%arg0: i32) -> (i32, i32) {
    %c0_i32 = arith.constant 0 : i32
    %c0_i32_0 = arith.constant 0 : i32
    %c0_i32_1 = arith.constant 0 : i32
    return %c0_i32, %c0_i32_0 : i32, i32
  }
  func.func @transform_3(%arg0: i32) -> (i32, i32) {
    %c0_i32 = arith.constant 0 : i32
    %c0_i32_0 = arith.constant 0 : i32
    %c0_i32_1 = arith.constant 0 : i32
    return %c0_i32, %c0_i32_0 : i32, i32
  }
  func.func @transform_4(%arg0: i32) -> (i32, i32) {
    %c0_i32 = arith.constant 0 : i32
    %c0_i32_0 = arith.constant 0 : i32
    return %c0_i32, %arg0 : i32, i32
  }
}

module attributes {stable_mosaic.version = 11 : i64} {
  func.func @_matmul_affine_kernel(%arg0: i32, %arg1: memref<32x144xbf16, #tpu.memory_space<vmem>>, %arg2: memref<144x128xbf16, #tpu.memory_space<vmem>>, %arg3: memref<32x1xf32, #tpu.memory_space<vmem>>, %arg4: memref<32x1xf32, #tpu.memory_space<vmem>>, %arg5: memref<32x128xbf16, #tpu.memory_space<vmem>>) attributes {dimension_semantics = [#tpu.dimension_semantics<parallel>], iteration_bounds = array<i64: 1>, scalar_prefetch = 0 : i64, scratch_operands = 0 : i64, tpu.core_type = #tpu.core_type<tc>, window_params = [{pipeline_mode = #tpu.pipeline_mode<synchronous>, transform_indices = @transform_0, window_bounds = array<i64: 32, 144>}, {transform_indices = @transform_1, window_bounds = array<i64: 144, 128>}, {pipeline_mode = #tpu.pipeline_mode<synchronous>, transform_indices = @transform_2, window_bounds = array<i64: 32, 1>}, {pipeline_mode = #tpu.pipeline_mode<synchronous>, transform_indices = @transform_3, window_bounds = array<i64: 32, 1>}, {transform_indices = @transform_4, window_bounds = array<i64: 32, 128>}]} {
    %c0 = arith.constant 0 : index
    %c0_0 = arith.constant 0 : index
    %0 = vector.load %arg1[%c0, %c0_0] : memref<32x144xbf16, #tpu.memory_space<vmem>>, vector<32x144xbf16>
    %c0_1 = arith.constant 0 : index
    %c0_2 = arith.constant 0 : index
    %1 = vector.load %arg2[%c0_1, %c0_2] : memref<144x128xbf16, #tpu.memory_space<vmem>>, vector<144x128xbf16>
    %cst = arith.constant dense<0.000000e+00> : vector<32x128xf32>
    %2 = tpu.matmul %0, %1, %cst {dimension_numbers = #tpu.dot_dimension_numbers<[1], [0], [0], [1], [0, 0, 1, 1], [], []>} : vector<32x144xbf16>, vector<144x128xbf16>, vector<32x128xf32> -> vector<32x128xf32>
    %c0_3 = arith.constant 0 : index
    %c0_4 = arith.constant 0 : index
    %3 = vector.load %arg3[%c0_3, %c0_4] : memref<32x1xf32, #tpu.memory_space<vmem>>, vector<32x1xf32>
    %4 = vector.broadcast %3 : vector<32x1xf32> to vector<32x128xf32>
    %5 = arith.mulf %2, %4 : vector<32x128xf32>
    %c0_5 = arith.constant 0 : index
    %c0_6 = arith.constant 0 : index
    %6 = vector.load %arg4[%c0_5, %c0_6] : memref<32x1xf32, #tpu.memory_space<vmem>>, vector<32x1xf32>
    %7 = vector.broadcast %6 : vector<32x1xf32> to vector<32x128xf32>
    %8 = arith.addf %5, %7 : vector<32x128xf32>
    %cst_7 = arith.constant 0.000000e+00 : f32
    %9 = vector.broadcast %cst_7 : f32 to vector<32x128xf32>
    %10 = arith.maximumf %8, %9 : vector<32x128xf32>
    %11 = arith.truncf %10 : vector<32x128xf32> to vector<32x128xbf16>
    %c0_8 = arith.constant 0 : index
    %c0_9 = arith.constant 0 : index
    %12 = vector.load %arg5[%c0_8, %c0_9] : memref<32x128xbf16, #tpu.memory_space<vmem>>, vector<32x128xbf16>
    tpu.vector_store %arg5[%c0_8, %c0_9], %11 {strides = array<i32>} : memref<32x128xbf16, #tpu.memory_space<vmem>>, vector<32x128xbf16>,
    return
  }
  func.func @transform_0(%arg0: i32) -> (i32, i32) {
    %c0_i32 = arith.constant 0 : i32
    %c0_i32_0 = arith.constant 0 : i32
    %c0_i32_1 = arith.constant 0 : i32
    return %c0_i32, %c0_i32_0 : i32, i32
  }
  func.func @transform_1(%arg0: i32) -> (i32, i32) {
    %c0_i32 = arith.constant 0 : i32
    %c0_i32_0 = arith.constant 0 : i32
    return %c0_i32, %arg0 : i32, i32
  }
  func.func @transform_2(%arg0: i32) -> (i32, i32) {
    %c0_i32 = arith.constant 0 : i32
    %c0_i32_0 = arith.constant 0 : i32
    %c0_i32_1 = arith.constant 0 : i32
    return %c0_i32, %c0_i32_0 : i32, i32
  }
  func.func @transform_3(%arg0: i32) -> (i32, i32) {
    %c0_i32 = arith.constant 0 : i32
    %c0_i32_0 = arith.constant 0 : i32
    %c0_i32_1 = arith.constant 0 : i32
    return %c0_i32, %c0_i32_0 : i32, i32
  }
  func.func @transform_4(%arg0: i32) -> (i32, i32) {
    %c0_i32 = arith.constant 0 : i32
    %c0_i32_0 = arith.constant 0 : i32
    return %c0_i32, %arg0 : i32, i32
  }
}

module attributes {stable_mosaic.version = 11 : i64} {
  func.func @_matmul_affine_kernel(%arg0: i32, %arg1: memref<16x288xbf16, #tpu.memory_space<vmem>>, %arg2: memref<288x128xbf16, #tpu.memory_space<vmem>>, %arg3: memref<16x1xf32, #tpu.memory_space<vmem>>, %arg4: memref<16x1xf32, #tpu.memory_space<vmem>>, %arg5: memref<16x128xbf16, #tpu.memory_space<vmem>>) attributes {dimension_semantics = [#tpu.dimension_semantics<parallel>], iteration_bounds = array<i64: 1>, scalar_prefetch = 0 : i64, scratch_operands = 0 : i64, tpu.core_type = #tpu.core_type<tc>, window_params = [{pipeline_mode = #tpu.pipeline_mode<synchronous>, transform_indices = @transform_0, window_bounds = array<i64: 16, 288>}, {transform_indices = @transform_1, window_bounds = array<i64: 288, 128>}, {pipeline_mode = #tpu.pipeline_mode<synchronous>, transform_indices = @transform_2, window_bounds = array<i64: 16, 1>}, {pipeline_mode = #tpu.pipeline_mode<synchronous>, transform_indices = @transform_3, window_bounds = array<i64: 16, 1>}, {transform_indices = @transform_4, window_bounds = array<i64: 16, 128>}]} {
    %c0 = arith.constant 0 : index
    %c0_0 = arith.constant 0 : index
    %0 = vector.load %arg1[%c0, %c0_0] : memref<16x288xbf16, #tpu.memory_space<vmem>>, vector<16x288xbf16>
    %c0_1 = arith.constant 0 : index
    %c0_2 = arith.constant 0 : index
    %1 = vector.load %arg2[%c0_1, %c0_2] : memref<288x128xbf16, #tpu.memory_space<vmem>>, vector<288x128xbf16>
    %cst = arith.constant dense<0.000000e+00> : vector<16x128xf32>
    %2 = tpu.matmul %0, %1, %cst {dimension_numbers = #tpu.dot_dimension_numbers<[1], [0], [0], [1], [0, 0, 1, 1], [], []>} : vector<16x288xbf16>, vector<288x128xbf16>, vector<16x128xf32> -> vector<16x128xf32>
    %c0_3 = arith.constant 0 : index
    %c0_4 = arith.constant 0 : index
    %3 = vector.load %arg3[%c0_3, %c0_4] : memref<16x1xf32, #tpu.memory_space<vmem>>, vector<16x1xf32>
    %4 = vector.broadcast %3 : vector<16x1xf32> to vector<16x128xf32>
    %5 = arith.mulf %2, %4 : vector<16x128xf32>
    %c0_5 = arith.constant 0 : index
    %c0_6 = arith.constant 0 : index
    %6 = vector.load %arg4[%c0_5, %c0_6] : memref<16x1xf32, #tpu.memory_space<vmem>>, vector<16x1xf32>
    %7 = vector.broadcast %6 : vector<16x1xf32> to vector<16x128xf32>
    %8 = arith.addf %5, %7 : vector<16x128xf32>
    %cst_7 = arith.constant 0.000000e+00 : f32
    %9 = vector.broadcast %cst_7 : f32 to vector<16x128xf32>
    %10 = arith.maximumf %8, %9 : vector<16x128xf32>
    %11 = arith.truncf %10 : vector<16x128xf32> to vector<16x128xbf16>
    %c0_8 = arith.constant 0 : index
    %c0_9 = arith.constant 0 : index
    %12 = vector.load %arg5[%c0_8, %c0_9] : memref<16x128xbf16, #tpu.memory_space<vmem>>, vector<16x128xbf16>
    tpu.vector_store %arg5[%c0_8, %c0_9], %11 {strides = array<i32>} : memref<16x128xbf16, #tpu.memory_space<vmem>>, vector<16x128xbf16>,
    return
  }
  func.func @transform_0(%arg0: i32) -> (i32, i32) {
    %c0_i32 = arith.constant 0 : i32
    %c0_i32_0 = arith.constant 0 : i32
    %c0_i32_1 = arith.constant 0 : i32
    return %c0_i32, %c0_i32_0 : i32, i32
  }
  func.func @transform_1(%arg0: i32) -> (i32, i32) {
    %c0_i32 = arith.constant 0 : i32
    %c0_i32_0 = arith.constant 0 : i32
    return %c0_i32, %arg0 : i32, i32
  }
  func.func @transform_2(%arg0: i32) -> (i32, i32) {
    %c0_i32 = arith.constant 0 : i32
    %c0_i32_0 = arith.constant 0 : i32
    %c0_i32_1 = arith.constant 0 : i32
    return %c0_i32, %c0_i32_0 : i32, i32
  }
  func.func @transform_3(%arg0: i32) -> (i32, i32) {
    %c0_i32 = arith.constant 0 : i32
    %c0_i32_0 = arith.constant 0 : i32
    %c0_i32_1 = arith.constant 0 : i32
    return %c0_i32, %c0_i32_0 : i32, i32
  }
  func.func @transform_4(%arg0: i32) -> (i32, i32) {
    %c0_i32 = arith.constant 0 : i32
    %c0_i32_0 = arith.constant 0 : i32
    return %c0_i32, %arg0 : i32, i32
  }
}

module attributes {stable_mosaic.version = 11 : i64} {
  func.func @_matmul_affine_kernel(%arg0: i32, %arg1: memref<16x32xbf16, #tpu.memory_space<vmem>>, %arg2: memref<32x128xbf16, #tpu.memory_space<vmem>>, %arg3: memref<16x1xf32, #tpu.memory_space<vmem>>, %arg4: memref<16x1xf32, #tpu.memory_space<vmem>>, %arg5: memref<16x128xbf16, #tpu.memory_space<vmem>>) attributes {dimension_semantics = [#tpu.dimension_semantics<parallel>], iteration_bounds = array<i64: 1>, scalar_prefetch = 0 : i64, scratch_operands = 0 : i64, tpu.core_type = #tpu.core_type<tc>, window_params = [{pipeline_mode = #tpu.pipeline_mode<synchronous>, transform_indices = @transform_0, window_bounds = array<i64: 16, 32>}, {transform_indices = @transform_1, window_bounds = array<i64: 32, 128>}, {pipeline_mode = #tpu.pipeline_mode<synchronous>, transform_indices = @transform_2, window_bounds = array<i64: 16, 1>}, {pipeline_mode = #tpu.pipeline_mode<synchronous>, transform_indices = @transform_3, window_bounds = array<i64: 16, 1>}, {transform_indices = @transform_4, window_bounds = array<i64: 16, 128>}]} {
    %c0 = arith.constant 0 : index
    %c0_0 = arith.constant 0 : index
    %0 = vector.load %arg1[%c0, %c0_0] : memref<16x32xbf16, #tpu.memory_space<vmem>>, vector<16x32xbf16>
    %c0_1 = arith.constant 0 : index
    %c0_2 = arith.constant 0 : index
    %1 = vector.load %arg2[%c0_1, %c0_2] : memref<32x128xbf16, #tpu.memory_space<vmem>>, vector<32x128xbf16>
    %cst = arith.constant dense<0.000000e+00> : vector<16x128xf32>
    %2 = tpu.matmul %0, %1, %cst {dimension_numbers = #tpu.dot_dimension_numbers<[1], [0], [0], [1], [0, 0, 1, 1], [], []>} : vector<16x32xbf16>, vector<32x128xbf16>, vector<16x128xf32> -> vector<16x128xf32>
    %c0_3 = arith.constant 0 : index
    %c0_4 = arith.constant 0 : index
    %3 = vector.load %arg3[%c0_3, %c0_4] : memref<16x1xf32, #tpu.memory_space<vmem>>, vector<16x1xf32>
    %4 = vector.broadcast %3 : vector<16x1xf32> to vector<16x128xf32>
    %5 = arith.mulf %2, %4 : vector<16x128xf32>
    %c0_5 = arith.constant 0 : index
    %c0_6 = arith.constant 0 : index
    %6 = vector.load %arg4[%c0_5, %c0_6] : memref<16x1xf32, #tpu.memory_space<vmem>>, vector<16x1xf32>
    %7 = vector.broadcast %6 : vector<16x1xf32> to vector<16x128xf32>
    %8 = arith.addf %5, %7 : vector<16x128xf32>
    %cst_7 = arith.constant 0.000000e+00 : f32
    %9 = vector.broadcast %cst_7 : f32 to vector<16x128xf32>
    %10 = arith.maximumf %8, %9 : vector<16x128xf32>
    %11 = arith.truncf %10 : vector<16x128xf32> to vector<16x128xbf16>
    %c0_8 = arith.constant 0 : index
    %c0_9 = arith.constant 0 : index
    %12 = vector.load %arg5[%c0_8, %c0_9] : memref<16x128xbf16, #tpu.memory_space<vmem>>, vector<16x128xbf16>
    tpu.vector_store %arg5[%c0_8, %c0_9], %11 {strides = array<i32>} : memref<16x128xbf16, #tpu.memory_space<vmem>>, vector<16x128xbf16>,
    return
  }
  func.func @transform_0(%arg0: i32) -> (i32, i32) {
    %c0_i32 = arith.constant 0 : i32
    %c0_i32_0 = arith.constant 0 : i32
    %c0_i32_1 = arith.constant 0 : i32
    return %c0_i32, %c0_i32_0 : i32, i32
  }
  func.func @transform_1(%arg0: i32) -> (i32, i32) {
    %c0_i32 = arith.constant 0 : i32
    %c0_i32_0 = arith.constant 0 : i32
    return %c0_i32, %arg0 : i32, i32
  }
  func.func @transform_2(%arg0: i32) -> (i32, i32) {
    %c0_i32 = arith.constant 0 : i32
    %c0_i32_0 = arith.constant 0 : i32
    %c0_i32_1 = arith.constant 0 : i32
    return %c0_i32, %c0_i32_0 : i32, i32
  }
  func.func @transform_3(%arg0: i32) -> (i32, i32) {
    %c0_i32 = arith.constant 0 : i32
    %c0_i32_0 = arith.constant 0 : i32
    %c0_i32_1 = arith.constant 0 : i32
    return %c0_i32, %c0_i32_0 : i32, i32
  }
  func.func @transform_4(%arg0: i32) -> (i32, i32) {
    %c0_i32 = arith.constant 0 : i32
    %c0_i32_0 = arith.constant 0 : i32
    return %c0_i32, %arg0 : i32, i32
  }
}

module attributes {stable_mosaic.version = 11 : i64} {
  func.func @_gap_conv_kernel(%arg0: i32, %arg1: memref<32x2x16xbf16, #tpu.memory_space<vmem>>, %arg2: memref<16x32xf32, #tpu.memory_space<vmem>>, %arg3: memref<16x1xf32, #tpu.memory_space<vmem>>, %arg4: memref<16x1xf32, #tpu.memory_space<vmem>>, %arg5: memref<16x2xbf16, #tpu.memory_space<vmem>>, %arg6: memref<32x2xf32, #tpu.memory_space<vmem>>) attributes {dimension_semantics = [#tpu.dimension_semantics<arbitrary>], iteration_bounds = array<i64: 1>, scalar_prefetch = 0 : i64, scratch_operands = 1 : i64, tpu.core_type = #tpu.core_type<tc>, window_params = [{transform_indices = @transform_0, window_bounds = array<i64: 32, 2, 16>}, {pipeline_mode = #tpu.pipeline_mode<synchronous>, transform_indices = @transform_1, window_bounds = array<i64: 16, 32>}, {pipeline_mode = #tpu.pipeline_mode<synchronous>, transform_indices = @transform_2, window_bounds = array<i64: 16, 1>}, {pipeline_mode = #tpu.pipeline_mode<synchronous>, transform_indices = @transform_3, window_bounds = array<i64: 16, 1>}, {pipeline_mode = #tpu.pipeline_mode<synchronous>, transform_indices = @transform_4, window_bounds = array<i64: 16, 2>}]} {
    %c0_i32 = arith.constant 0 : i32
    %0 = arith.cmpi eq, %arg0, %c0_i32 : i32
    %1 = arith.extui %0 : i1 to i32
    %c0_i32_0 = arith.constant 0 : i32
    %2 = arith.cmpi ne, %1, %c0_i32_0 : i32
    scf.if %2 {
      %cst_9 = arith.constant 0.000000e+00 : f32
      %12 = vector.broadcast %cst_9 : f32 to vector<32x2xf32>
      %c0_10 = arith.constant 0 : index
      %c0_11 = arith.constant 0 : index
      %13 = vector.load %arg6[%c0_10, %c0_11] : memref<32x2xf32, #tpu.memory_space<vmem>>, vector<32x2xf32>
      tpu.vector_store %arg6[%c0_10, %c0_11], %12 {strides = array<i32>} : memref<32x2xf32, #tpu.memory_space<vmem>>, vector<32x2xf32>,
    } else {
    }
    %c0 = arith.constant 0 : index
    %c0_1 = arith.constant 0 : index
    %3 = vector.load %arg6[%c0, %c0_1] : memref<32x2xf32, #tpu.memory_space<vmem>>, vector<32x2xf32>
    %c0_2 = arith.constant 0 : index
    %c0_3 = arith.constant 0 : index
    %c0_4 = arith.constant 0 : index
    %4 = vector.load %arg1[%c0_2, %c0_3, %c0_4] : memref<32x2x16xbf16, #tpu.memory_space<vmem>>, vector<32x2x16xbf16>
    %5 = arith.extf %4 : vector<32x2x16xbf16> to vector<32x2x16xf32>
    %cst = arith.constant dense<0.000000e+00> : vector<32x2xf32>
    %6 = vector.multi_reduction <add>, %5, %cst [2] : vector<32x2x16xf32> to vector<32x2xf32>
    %7 = arith.addf %3, %6 : vector<32x2xf32>
    %c0_5 = arith.constant 0 : index
    %c0_6 = arith.constant 0 : index
    %8 = vector.load %arg6[%c0_5, %c0_6] : memref<32x2xf32, #tpu.memory_space<vmem>>, vector<32x2xf32>
    tpu.vector_store %arg6[%c0_5, %c0_6], %7 {strides = array<i32>} : memref<32x2xf32, #tpu.memory_space<vmem>>, vector<32x2xf32>,
    %c0_i32_7 = arith.constant 0 : i32
    %9 = arith.cmpi eq, %arg0, %c0_i32_7 : i32
    %10 = arith.extui %9 : i1 to i32
    %c0_i32_8 = arith.constant 0 : i32
    %11 = arith.cmpi ne, %10, %c0_i32_8 : i32
    scf.if %11 {
      %c0_9 = arith.constant 0 : index
      %c0_10 = arith.constant 0 : index
      %12 = vector.load %arg6[%c0_9, %c0_10] : memref<32x2xf32, #tpu.memory_space<vmem>>, vector<32x2xf32>
      %cst_11 = arith.constant 6.250000e-02 : f32
      %13 = vector.broadcast %cst_11 : f32 to vector<32x2xf32>
      %14 = arith.mulf %12, %13 : vector<32x2xf32>
      %c0_12 = arith.constant 0 : index
      %c0_13 = arith.constant 0 : index
      %15 = vector.load %arg2[%c0_12, %c0_13] : memref<16x32xf32, #tpu.memory_space<vmem>>, vector<16x32xf32>
      %cst_14 = arith.constant dense<0.000000e+00> : vector<16x2xf32>
      %16 = tpu.matmul %15, %14, %cst_14 {dimension_numbers = #tpu.dot_dimension_numbers<[1], [0], [0], [1], [0, 0, 1, 1], [], []>} : vector<16x32xf32>, vector<32x2xf32>, vector<16x2xf32> -> vector<16x2xf32>
      %c0_15 = arith.constant 0 : index
      %c0_16 = arith.constant 0 : index
      %17 = vector.load %arg3[%c0_15, %c0_16] : memref<16x1xf32, #tpu.memory_space<vmem>>, vector<16x1xf32>
      %18 = vector.broadcast %17 : vector<16x1xf32> to vector<16x2xf32>
      %19 = arith.mulf %16, %18 : vector<16x2xf32>
      %c0_17 = arith.constant 0 : index
      %c0_18 = arith.constant 0 : index
      %20 = vector.load %arg4[%c0_17, %c0_18] : memref<16x1xf32, #tpu.memory_space<vmem>>, vector<16x1xf32>
      %21 = vector.broadcast %20 : vector<16x1xf32> to vector<16x2xf32>
      %22 = arith.addf %19, %21 : vector<16x2xf32>
      %cst_19 = arith.constant 0.000000e+00 : f32
      %23 = vector.broadcast %cst_19 : f32 to vector<16x2xf32>
      %24 = arith.maximumf %22, %23 : vector<16x2xf32>
      %25 = arith.truncf %24 : vector<16x2xf32> to vector<16x2xbf16>
      %c0_20 = arith.constant 0 : index
      %c0_21 = arith.constant 0 : index
      %26 = vector.load %arg5[%c0_20, %c0_21] : memref<16x2xbf16, #tpu.memory_space<vmem>>, vector<16x2xbf16>
      tpu.vector_store %arg5[%c0_20, %c0_21], %25 {strides = array<i32>} : memref<16x2xbf16, #tpu.memory_space<vmem>>, vector<16x2xbf16>,
    } else {
    }
    return
  }
  func.func @transform_0(%arg0: i32) -> (i32, i32, i32) {
    %c0_i32 = arith.constant 0 : i32
    %c0_i32_0 = arith.constant 0 : i32
    %c0_i32_1 = arith.constant 0 : i32
    return %c0_i32, %c0_i32_0, %arg0 : i32, i32, i32
  }
  func.func @transform_1(%arg0: i32) -> (i32, i32) {
    %c0_i32 = arith.constant 0 : i32
    %c0_i32_0 = arith.constant 0 : i32
    %c0_i32_1 = arith.constant 0 : i32
    return %c0_i32, %c0_i32_0 : i32, i32
  }
  func.func @transform_2(%arg0: i32) -> (i32, i32) {
    %c0_i32 = arith.constant 0 : i32
    %c0_i32_0 = arith.constant 0 : i32
    %c0_i32_1 = arith.constant 0 : i32
    return %c0_i32, %c0_i32_0 : i32, i32
  }
  func.func @transform_3(%arg0: i32) -> (i32, i32) {
    %c0_i32 = arith.constant 0 : i32
    %c0_i32_0 = arith.constant 0 : i32
    %c0_i32_1 = arith.constant 0 : i32
    return %c0_i32, %c0_i32_0 : i32, i32
  }
  func.func @transform_4(%arg0: i32) -> (i32, i32) {
    %c0_i32 = arith.constant 0 : i32
    %c0_i32_0 = arith.constant 0 : i32
    %c0_i32_1 = arith.constant 0 : i32
    return %c0_i32, %c0_i32_0 : i32, i32
  }
}

module attributes {stable_mosaic.version = 11 : i64} {
  func.func @_aspp_proj_kernel(%arg0: i32, %arg1: memref<16x128xbf16, #tpu.memory_space<vmem>>, %arg2: memref<16x128xbf16, #tpu.memory_space<vmem>>, %arg3: memref<16x128xbf16, #tpu.memory_space<vmem>>, %arg4: memref<16x128xbf16, #tpu.memory_space<vmem>>, %arg5: memref<5x16x16xbf16, #tpu.memory_space<vmem>>, %arg6: memref<16x2xbf16, #tpu.memory_space<vmem>>, %arg7: memref<2x128xbf16, #tpu.memory_space<vmem>>, %arg8: memref<16x1xf32, #tpu.memory_space<vmem>>, %arg9: memref<16x1xf32, #tpu.memory_space<vmem>>, %arg10: memref<16x128xbf16, #tpu.memory_space<vmem>>) attributes {dimension_semantics = [#tpu.dimension_semantics<parallel>], iteration_bounds = array<i64: 1>, scalar_prefetch = 0 : i64, scratch_operands = 0 : i64, tpu.core_type = #tpu.core_type<tc>, window_params = [{transform_indices = @transform_0, window_bounds = array<i64: 16, 128>}, {transform_indices = @transform_1, window_bounds = array<i64: 16, 128>}, {transform_indices = @transform_2, window_bounds = array<i64: 16, 128>}, {transform_indices = @transform_3, window_bounds = array<i64: 16, 128>}, {pipeline_mode = #tpu.pipeline_mode<synchronous>, transform_indices = @transform_4, window_bounds = array<i64: 5, 16, 16>}, {pipeline_mode = #tpu.pipeline_mode<synchronous>, transform_indices = @transform_5, window_bounds = array<i64: 16, 2>}, {transform_indices = @transform_6, window_bounds = array<i64: 2, 128>}, {pipeline_mode = #tpu.pipeline_mode<synchronous>, transform_indices = @transform_7, window_bounds = array<i64: 16, 1>}, {pipeline_mode = #tpu.pipeline_mode<synchronous>, transform_indices = @transform_8, window_bounds = array<i64: 16, 1>}, {transform_indices = @transform_9, window_bounds = array<i64: 16, 128>}]} {
    %c0 = arith.constant 0 : index
    %c0_0 = arith.constant 0 : index
    %c0_1 = arith.constant 0 : index
    %0 = vector.load %arg5[%c0, %c0_0, %c0_1] : memref<5x16x16xbf16, #tpu.memory_space<vmem>>, vector<1x16x16xbf16>
    %1 = vector.shape_cast %0 : vector<1x16x16xbf16> to vector<16x16xbf16>
    %c0_2 = arith.constant 0 : index
    %c0_3 = arith.constant 0 : index
    %2 = vector.load %arg1[%c0_2, %c0_3] : memref<16x128xbf16, #tpu.memory_space<vmem>>, vector<16x128xbf16>
    %cst = arith.constant dense<0.000000e+00> : vector<16x128xf32>
    %3 = tpu.matmul %1, %2, %cst {dimension_numbers = #tpu.dot_dimension_numbers<[1], [0], [0], [1], [0, 0, 1, 1], [], []>} : vector<16x16xbf16>, vector<16x128xbf16>, vector<16x128xf32> -> vector<16x128xf32>
    %c1 = arith.constant 1 : index
    %c0_4 = arith.constant 0 : index
    %c0_5 = arith.constant 0 : index
    %4 = vector.load %arg5[%c1, %c0_4, %c0_5] : memref<5x16x16xbf16, #tpu.memory_space<vmem>>, vector<1x16x16xbf16>
    %5 = vector.shape_cast %4 : vector<1x16x16xbf16> to vector<16x16xbf16>
    %c0_6 = arith.constant 0 : index
    %c0_7 = arith.constant 0 : index
    %6 = vector.load %arg2[%c0_6, %c0_7] : memref<16x128xbf16, #tpu.memory_space<vmem>>, vector<16x128xbf16>
    %cst_8 = arith.constant dense<0.000000e+00> : vector<16x128xf32>
    %7 = tpu.matmul %5, %6, %cst_8 {dimension_numbers = #tpu.dot_dimension_numbers<[1], [0], [0], [1], [0, 0, 1, 1], [], []>} : vector<16x16xbf16>, vector<16x128xbf16>, vector<16x128xf32> -> vector<16x128xf32>
    %8 = arith.addf %3, %7 : vector<16x128xf32>
    %c2 = arith.constant 2 : index
    %c0_9 = arith.constant 0 : index
    %c0_10 = arith.constant 0 : index
    %9 = vector.load %arg5[%c2, %c0_9, %c0_10] : memref<5x16x16xbf16, #tpu.memory_space<vmem>>, vector<1x16x16xbf16>
    %10 = vector.shape_cast %9 : vector<1x16x16xbf16> to vector<16x16xbf16>
    %c0_11 = arith.constant 0 : index
    %c0_12 = arith.constant 0 : index
    %11 = vector.load %arg3[%c0_11, %c0_12] : memref<16x128xbf16, #tpu.memory_space<vmem>>, vector<16x128xbf16>
    %cst_13 = arith.constant dense<0.000000e+00> : vector<16x128xf32>
    %12 = tpu.matmul %10, %11, %cst_13 {dimension_numbers = #tpu.dot_dimension_numbers<[1], [0], [0], [1], [0, 0, 1, 1], [], []>} : vector<16x16xbf16>, vector<16x128xbf16>, vector<16x128xf32> -> vector<16x128xf32>
    %13 = arith.addf %8, %12 : vector<16x128xf32>
    %c3 = arith.constant 3 : index
    %c0_14 = arith.constant 0 : index
    %c0_15 = arith.constant 0 : index
    %14 = vector.load %arg5[%c3, %c0_14, %c0_15] : memref<5x16x16xbf16, #tpu.memory_space<vmem>>, vector<1x16x16xbf16>
    %15 = vector.shape_cast %14 : vector<1x16x16xbf16> to vector<16x16xbf16>
    %c0_16 = arith.constant 0 : index
    %c0_17 = arith.constant 0 : index
    %16 = vector.load %arg4[%c0_16, %c0_17] : memref<16x128xbf16, #tpu.memory_space<vmem>>, vector<16x128xbf16>
    %cst_18 = arith.constant dense<0.000000e+00> : vector<16x128xf32>
    %17 = tpu.matmul %15, %16, %cst_18 {dimension_numbers = #tpu.dot_dimension_numbers<[1], [0], [0], [1], [0, 0, 1, 1], [], []>} : vector<16x16xbf16>, vector<16x128xbf16>, vector<16x128xf32> -> vector<16x128xf32>
    %18 = arith.addf %13, %17 : vector<16x128xf32>
    %c4 = arith.constant 4 : index
    %c0_19 = arith.constant 0 : index
    %c0_20 = arith.constant 0 : index
    %19 = vector.load %arg5[%c4, %c0_19, %c0_20] : memref<5x16x16xbf16, #tpu.memory_space<vmem>>, vector<1x16x16xbf16>
    %20 = vector.shape_cast %19 : vector<1x16x16xbf16> to vector<16x16xbf16>
    %c0_21 = arith.constant 0 : index
    %c0_22 = arith.constant 0 : index
    %21 = vector.load %arg6[%c0_21, %c0_22] : memref<16x2xbf16, #tpu.memory_space<vmem>>, vector<16x2xbf16>
    %cst_23 = arith.constant dense<0.000000e+00> : vector<16x2xf32>
    %22 = tpu.matmul %20, %21, %cst_23 {dimension_numbers = #tpu.dot_dimension_numbers<[1], [0], [0], [1], [0, 0, 1, 1], [], []>} : vector<16x16xbf16>, vector<16x2xbf16>, vector<16x2xf32> -> vector<16x2xf32>
    %23 = arith.truncf %22 : vector<16x2xf32> to vector<16x2xbf16>
    %c0_24 = arith.constant 0 : index
    %c0_25 = arith.constant 0 : index
    %24 = vector.load %arg7[%c0_24, %c0_25] : memref<2x128xbf16, #tpu.memory_space<vmem>>, vector<2x128xbf16>
    %cst_26 = arith.constant dense<0.000000e+00> : vector<16x128xf32>
    %25 = tpu.matmul %23, %24, %cst_26 {dimension_numbers = #tpu.dot_dimension_numbers<[1], [0], [0], [1], [0, 0, 1, 1], [], []>} : vector<16x2xbf16>, vector<2x128xbf16>, vector<16x128xf32> -> vector<16x128xf32>
    %26 = arith.addf %18, %25 : vector<16x128xf32>
    %c0_27 = arith.constant 0 : index
    %c0_28 = arith.constant 0 : index
    %27 = vector.load %arg8[%c0_27, %c0_28] : memref<16x1xf32, #tpu.memory_space<vmem>>, vector<16x1xf32>
    %28 = vector.broadcast %27 : vector<16x1xf32> to vector<16x128xf32>
    %29 = arith.mulf %26, %28 : vector<16x128xf32>
    %c0_29 = arith.constant 0 : index
    %c0_30 = arith.constant 0 : index
    %30 = vector.load %arg9[%c0_29, %c0_30] : memref<16x1xf32, #tpu.memory_space<vmem>>, vector<16x1xf32>
    %31 = vector.broadcast %30 : vector<16x1xf32> to vector<16x128xf32>
    %32 = arith.addf %29, %31 : vector<16x128xf32>
    %cst_31 = arith.constant 0.000000e+00 : f32
    %33 = vector.broadcast %cst_31 : f32 to vector<16x128xf32>
    %34 = arith.maximumf %32, %33 : vector<16x128xf32>
    %35 = arith.truncf %34 : vector<16x128xf32> to vector<16x128xbf16>
    %c0_32 = arith.constant 0 : index
    %c0_33 = arith.constant 0 : index
    %36 = vector.load %arg10[%c0_32, %c0_33] : memref<16x128xbf16, #tpu.memory_space<vmem>>, vector<16x128xbf16>
    tpu.vector_store %arg10[%c0_32, %c0_33], %35 {strides = array<i32>} : memref<16x128xbf16, #tpu.memory_space<vmem>>, vector<16x128xbf16>,
    return
  }
  func.func @transform_0(%arg0: i32) -> (i32, i32) {
    %c0_i32 = arith.constant 0 : i32
    %c0_i32_0 = arith.constant 0 : i32
    return %c0_i32, %arg0 : i32, i32
  }
  func.func @transform_1(%arg0: i32) -> (i32, i32) {
    %c0_i32 = arith.constant 0 : i32
    %c0_i32_0 = arith.constant 0 : i32
    return %c0_i32, %arg0 : i32, i32
  }
  func.func @transform_2(%arg0: i32) -> (i32, i32) {
    %c0_i32 = arith.constant 0 : i32
    %c0_i32_0 = arith.constant 0 : i32
    return %c0_i32, %arg0 : i32, i32
  }
  func.func @transform_3(%arg0: i32) -> (i32, i32) {
    %c0_i32 = arith.constant 0 : i32
    %c0_i32_0 = arith.constant 0 : i32
    return %c0_i32, %arg0 : i32, i32
  }
  func.func @transform_4(%arg0: i32) -> (i32, i32, i32) {
    %c0_i32 = arith.constant 0 : i32
    %c0_i32_0 = arith.constant 0 : i32
    %c0_i32_1 = arith.constant 0 : i32
    %c0_i32_2 = arith.constant 0 : i32
    return %c0_i32, %c0_i32_0, %c0_i32_1 : i32, i32, i32
  }
  func.func @transform_5(%arg0: i32) -> (i32, i32) {
    %c0_i32 = arith.constant 0 : i32
    %c0_i32_0 = arith.constant 0 : i32
    %c0_i32_1 = arith.constant 0 : i32
    return %c0_i32, %c0_i32_0 : i32, i32
  }
  func.func @transform_6(%arg0: i32) -> (i32, i32) {
    %c0_i32 = arith.constant 0 : i32
    %c0_i32_0 = arith.constant 0 : i32
    return %c0_i32, %arg0 : i32, i32
  }
  func.func @transform_7(%arg0: i32) -> (i32, i32) {
    %c0_i32 = arith.constant 0 : i32
    %c0_i32_0 = arith.constant 0 : i32
    %c0_i32_1 = arith.constant 0 : i32
    return %c0_i32, %c0_i32_0 : i32, i32
  }
  func.func @transform_8(%arg0: i32) -> (i32, i32) {
    %c0_i32 = arith.constant 0 : i32
    %c0_i32_0 = arith.constant 0 : i32
    %c0_i32_1 = arith.constant 0 : i32
    return %c0_i32, %c0_i32_0 : i32, i32
  }
  func.func @transform_9(%arg0: i32) -> (i32, i32) {
    %c0_i32 = arith.constant 0 : i32
    %c0_i32_0 = arith.constant 0 : i32
    return %c0_i32, %arg0 : i32, i32
  }
}

module attributes {stable_mosaic.version = 11 : i64} {
  func.func @_bilinear_kernel(%arg0: i32, %arg1: memref<16x64xbf16, #tpu.memory_space<vmem>>, %arg2: memref<16x16xbf16, #tpu.memory_space<vmem>>, %arg3: memref<16x64xbf16, #tpu.memory_space<vmem>>) attributes {dimension_semantics = [#tpu.dimension_semantics<parallel>], iteration_bounds = array<i64: 2>, scalar_prefetch = 0 : i64, scratch_operands = 0 : i64, tpu.core_type = #tpu.core_type<tc>, window_params = [{pipeline_mode = #tpu.pipeline_mode<synchronous>, transform_indices = @transform_0, window_bounds = array<i64: 16, 64>}, {transform_indices = @transform_1, window_bounds = array<i64: 16, 16>}, {transform_indices = @transform_2, window_bounds = array<i64: 16, 64>}]} {
    %c0 = arith.constant 0 : index
    %c0_0 = arith.constant 0 : index
    %0 = vector.load %arg2[%c0, %c0_0] : memref<16x16xbf16, #tpu.memory_space<vmem>>, vector<16x16xbf16>
    %c0_1 = arith.constant 0 : index
    %c0_2 = arith.constant 0 : index
    %1 = vector.load %arg1[%c0_1, %c0_2] : memref<16x64xbf16, #tpu.memory_space<vmem>>, vector<16x64xbf16>
    %cst = arith.constant dense<0.000000e+00> : vector<16x64xf32>
    %2 = tpu.matmul %0, %1, %cst {dimension_numbers = #tpu.dot_dimension_numbers<[1], [0], [0], [1], [0, 0, 1, 1], [], []>} : vector<16x16xbf16>, vector<16x64xbf16>, vector<16x64xf32> -> vector<16x64xf32>
    %3 = arith.truncf %2 : vector<16x64xf32> to vector<16x64xbf16>
    %c0_3 = arith.constant 0 : index
    %c0_4 = arith.constant 0 : index
    %4 = vector.load %arg3[%c0_3, %c0_4] : memref<16x64xbf16, #tpu.memory_space<vmem>>, vector<16x64xbf16>
    tpu.vector_store %arg3[%c0_3, %c0_4], %3 {strides = array<i32>} : memref<16x64xbf16, #tpu.memory_space<vmem>>, vector<16x64xbf16>,
    return
  }
  func.func @transform_0(%arg0: i32) -> (i32, i32) {
    %c0_i32 = arith.constant 0 : i32
    %c0_i32_0 = arith.constant 0 : i32
    %c0_i32_1 = arith.constant 0 : i32
    return %c0_i32, %c0_i32_0 : i32, i32
  }
  func.func @transform_1(%arg0: i32) -> (i32, i32) {
    %c0_i32 = arith.constant 0 : i32
    %c0_i32_0 = arith.constant 0 : i32
    return %arg0, %c0_i32 : i32, i32
  }
  func.func @transform_2(%arg0: i32) -> (i32, i32) {
    %c0_i32 = arith.constant 0 : i32
    %c0_i32_0 = arith.constant 0 : i32
    return %arg0, %c0_i32 : i32, i32
  }
}

module attributes {stable_mosaic.version = 11 : i64} {
  func.func @_matmul_affine_kernel(%arg0: i32, %arg1: memref<8x16xbf16, #tpu.memory_space<vmem>>, %arg2: memref<16x128xbf16, #tpu.memory_space<vmem>>, %arg3: memref<8x1xf32, #tpu.memory_space<vmem>>, %arg4: memref<8x1xf32, #tpu.memory_space<vmem>>, %arg5: memref<8x128xbf16, #tpu.memory_space<vmem>>) attributes {dimension_semantics = [#tpu.dimension_semantics<parallel>], iteration_bounds = array<i64: 1>, scalar_prefetch = 0 : i64, scratch_operands = 0 : i64, tpu.core_type = #tpu.core_type<tc>, window_params = [{pipeline_mode = #tpu.pipeline_mode<synchronous>, transform_indices = @transform_0, window_bounds = array<i64: 8, 16>}, {transform_indices = @transform_1, window_bounds = array<i64: 16, 128>}, {pipeline_mode = #tpu.pipeline_mode<synchronous>, transform_indices = @transform_2, window_bounds = array<i64: 8, 1>}, {pipeline_mode = #tpu.pipeline_mode<synchronous>, transform_indices = @transform_3, window_bounds = array<i64: 8, 1>}, {transform_indices = @transform_4, window_bounds = array<i64: 8, 128>}]} {
    %c0 = arith.constant 0 : index
    %c0_0 = arith.constant 0 : index
    %0 = vector.load %arg1[%c0, %c0_0] : memref<8x16xbf16, #tpu.memory_space<vmem>>, vector<8x16xbf16>
    %c0_1 = arith.constant 0 : index
    %c0_2 = arith.constant 0 : index
    %1 = vector.load %arg2[%c0_1, %c0_2] : memref<16x128xbf16, #tpu.memory_space<vmem>>, vector<16x128xbf16>
    %cst = arith.constant dense<0.000000e+00> : vector<8x128xf32>
    %2 = tpu.matmul %0, %1, %cst {dimension_numbers = #tpu.dot_dimension_numbers<[1], [0], [0], [1], [0, 0, 1, 1], [], []>} : vector<8x16xbf16>, vector<16x128xbf16>, vector<8x128xf32> -> vector<8x128xf32>
    %c0_3 = arith.constant 0 : index
    %c0_4 = arith.constant 0 : index
    %3 = vector.load %arg3[%c0_3, %c0_4] : memref<8x1xf32, #tpu.memory_space<vmem>>, vector<8x1xf32>
    %4 = vector.broadcast %3 : vector<8x1xf32> to vector<8x128xf32>
    %5 = arith.mulf %2, %4 : vector<8x128xf32>
    %c0_5 = arith.constant 0 : index
    %c0_6 = arith.constant 0 : index
    %6 = vector.load %arg4[%c0_5, %c0_6] : memref<8x1xf32, #tpu.memory_space<vmem>>, vector<8x1xf32>
    %7 = vector.broadcast %6 : vector<8x1xf32> to vector<8x128xf32>
    %8 = arith.addf %5, %7 : vector<8x128xf32>
    %cst_7 = arith.constant 0.000000e+00 : f32
    %9 = vector.broadcast %cst_7 : f32 to vector<8x128xf32>
    %10 = arith.maximumf %8, %9 : vector<8x128xf32>
    %11 = arith.truncf %10 : vector<8x128xf32> to vector<8x128xbf16>
    %c0_8 = arith.constant 0 : index
    %c0_9 = arith.constant 0 : index
    %12 = vector.load %arg5[%c0_8, %c0_9] : memref<8x128xbf16, #tpu.memory_space<vmem>>, vector<8x128xbf16>
    tpu.vector_store %arg5[%c0_8, %c0_9], %11 {strides = array<i32>} : memref<8x128xbf16, #tpu.memory_space<vmem>>, vector<8x128xbf16>,
    return
  }
  func.func @transform_0(%arg0: i32) -> (i32, i32) {
    %c0_i32 = arith.constant 0 : i32
    %c0_i32_0 = arith.constant 0 : i32
    %c0_i32_1 = arith.constant 0 : i32
    return %c0_i32, %c0_i32_0 : i32, i32
  }
  func.func @transform_1(%arg0: i32) -> (i32, i32) {
    %c0_i32 = arith.constant 0 : i32
    %c0_i32_0 = arith.constant 0 : i32
    return %c0_i32, %arg0 : i32, i32
  }
  func.func @transform_2(%arg0: i32) -> (i32, i32) {
    %c0_i32 = arith.constant 0 : i32
    %c0_i32_0 = arith.constant 0 : i32
    %c0_i32_1 = arith.constant 0 : i32
    return %c0_i32, %c0_i32_0 : i32, i32
  }
  func.func @transform_3(%arg0: i32) -> (i32, i32) {
    %c0_i32 = arith.constant 0 : i32
    %c0_i32_0 = arith.constant 0 : i32
    %c0_i32_1 = arith.constant 0 : i32
    return %c0_i32, %c0_i32_0 : i32, i32
  }
  func.func @transform_4(%arg0: i32) -> (i32, i32) {
    %c0_i32 = arith.constant 0 : i32
    %c0_i32_0 = arith.constant 0 : i32
    return %c0_i32, %arg0 : i32, i32
  }
}

module attributes {stable_mosaic.version = 11 : i64} {
  func.func @_matmul_affine_kernel(%arg0: i32, %arg1: memref<16x224xbf16, #tpu.memory_space<vmem>>, %arg2: memref<224x128xbf16, #tpu.memory_space<vmem>>, %arg3: memref<16x1xf32, #tpu.memory_space<vmem>>, %arg4: memref<16x1xf32, #tpu.memory_space<vmem>>, %arg5: memref<16x128xbf16, #tpu.memory_space<vmem>>) attributes {dimension_semantics = [#tpu.dimension_semantics<parallel>], iteration_bounds = array<i64: 1>, scalar_prefetch = 0 : i64, scratch_operands = 0 : i64, tpu.core_type = #tpu.core_type<tc>, window_params = [{pipeline_mode = #tpu.pipeline_mode<synchronous>, transform_indices = @transform_0, window_bounds = array<i64: 16, 224>}, {transform_indices = @transform_1, window_bounds = array<i64: 224, 128>}, {pipeline_mode = #tpu.pipeline_mode<synchronous>, transform_indices = @transform_2, window_bounds = array<i64: 16, 1>}, {pipeline_mode = #tpu.pipeline_mode<synchronous>, transform_indices = @transform_3, window_bounds = array<i64: 16, 1>}, {transform_indices = @transform_4, window_bounds = array<i64: 16, 128>}]} {
    %c0 = arith.constant 0 : index
    %c0_0 = arith.constant 0 : index
    %0 = vector.load %arg1[%c0, %c0_0] : memref<16x224xbf16, #tpu.memory_space<vmem>>, vector<16x224xbf16>
    %c0_1 = arith.constant 0 : index
    %c0_2 = arith.constant 0 : index
    %1 = vector.load %arg2[%c0_1, %c0_2] : memref<224x128xbf16, #tpu.memory_space<vmem>>, vector<224x128xbf16>
    %cst = arith.constant dense<0.000000e+00> : vector<16x128xf32>
    %2 = tpu.matmul %0, %1, %cst {dimension_numbers = #tpu.dot_dimension_numbers<[1], [0], [0], [1], [0, 0, 1, 1], [], []>} : vector<16x224xbf16>, vector<224x128xbf16>, vector<16x128xf32> -> vector<16x128xf32>
    %c0_3 = arith.constant 0 : index
    %c0_4 = arith.constant 0 : index
    %3 = vector.load %arg3[%c0_3, %c0_4] : memref<16x1xf32, #tpu.memory_space<vmem>>, vector<16x1xf32>
    %4 = vector.broadcast %3 : vector<16x1xf32> to vector<16x128xf32>
    %5 = arith.mulf %2, %4 : vector<16x128xf32>
    %c0_5 = arith.constant 0 : index
    %c0_6 = arith.constant 0 : index
    %6 = vector.load %arg4[%c0_5, %c0_6] : memref<16x1xf32, #tpu.memory_space<vmem>>, vector<16x1xf32>
    %7 = vector.broadcast %6 : vector<16x1xf32> to vector<16x128xf32>
    %8 = arith.addf %5, %7 : vector<16x128xf32>
    %cst_7 = arith.constant 0.000000e+00 : f32
    %9 = vector.broadcast %cst_7 : f32 to vector<16x128xf32>
    %10 = arith.maximumf %8, %9 : vector<16x128xf32>
    %11 = arith.truncf %10 : vector<16x128xf32> to vector<16x128xbf16>
    %c0_8 = arith.constant 0 : index
    %c0_9 = arith.constant 0 : index
    %12 = vector.load %arg5[%c0_8, %c0_9] : memref<16x128xbf16, #tpu.memory_space<vmem>>, vector<16x128xbf16>
    tpu.vector_store %arg5[%c0_8, %c0_9], %11 {strides = array<i32>} : memref<16x128xbf16, #tpu.memory_space<vmem>>, vector<16x128xbf16>,
    return
  }
  func.func @transform_0(%arg0: i32) -> (i32, i32) {
    %c0_i32 = arith.constant 0 : i32
    %c0_i32_0 = arith.constant 0 : i32
    %c0_i32_1 = arith.constant 0 : i32
    return %c0_i32, %c0_i32_0 : i32, i32
  }
  func.func @transform_1(%arg0: i32) -> (i32, i32) {
    %c0_i32 = arith.constant 0 : i32
    %c0_i32_0 = arith.constant 0 : i32
    return %c0_i32, %arg0 : i32, i32
  }
  func.func @transform_2(%arg0: i32) -> (i32, i32) {
    %c0_i32 = arith.constant 0 : i32
    %c0_i32_0 = arith.constant 0 : i32
    %c0_i32_1 = arith.constant 0 : i32
    return %c0_i32, %c0_i32_0 : i32, i32
  }
  func.func @transform_3(%arg0: i32) -> (i32, i32) {
    %c0_i32 = arith.constant 0 : i32
    %c0_i32_0 = arith.constant 0 : i32
    %c0_i32_1 = arith.constant 0 : i32
    return %c0_i32, %c0_i32_0 : i32, i32
  }
  func.func @transform_4(%arg0: i32) -> (i32, i32) {
    %c0_i32 = arith.constant 0 : i32
    %c0_i32_0 = arith.constant 0 : i32
    return %c0_i32, %arg0 : i32, i32
  }
}

module attributes {stable_mosaic.version = 11 : i64} {
  func.func @_matmul_affine_kernel(%arg0: i32, %arg1: memref<16x144xbf16, #tpu.memory_space<vmem>>, %arg2: memref<144x128xbf16, #tpu.memory_space<vmem>>, %arg3: memref<16x1xf32, #tpu.memory_space<vmem>>, %arg4: memref<16x1xf32, #tpu.memory_space<vmem>>, %arg5: memref<16x128xbf16, #tpu.memory_space<vmem>>) attributes {dimension_semantics = [#tpu.dimension_semantics<parallel>], iteration_bounds = array<i64: 1>, scalar_prefetch = 0 : i64, scratch_operands = 0 : i64, tpu.core_type = #tpu.core_type<tc>, window_params = [{pipeline_mode = #tpu.pipeline_mode<synchronous>, transform_indices = @transform_0, window_bounds = array<i64: 16, 144>}, {transform_indices = @transform_1, window_bounds = array<i64: 144, 128>}, {pipeline_mode = #tpu.pipeline_mode<synchronous>, transform_indices = @transform_2, window_bounds = array<i64: 16, 1>}, {pipeline_mode = #tpu.pipeline_mode<synchronous>, transform_indices = @transform_3, window_bounds = array<i64: 16, 1>}, {transform_indices = @transform_4, window_bounds = array<i64: 16, 128>}]} {
    %c0 = arith.constant 0 : index
    %c0_0 = arith.constant 0 : index
    %0 = vector.load %arg1[%c0, %c0_0] : memref<16x144xbf16, #tpu.memory_space<vmem>>, vector<16x144xbf16>
    %c0_1 = arith.constant 0 : index
    %c0_2 = arith.constant 0 : index
    %1 = vector.load %arg2[%c0_1, %c0_2] : memref<144x128xbf16, #tpu.memory_space<vmem>>, vector<144x128xbf16>
    %cst = arith.constant dense<0.000000e+00> : vector<16x128xf32>
    %2 = tpu.matmul %0, %1, %cst {dimension_numbers = #tpu.dot_dimension_numbers<[1], [0], [0], [1], [0, 0, 1, 1], [], []>} : vector<16x144xbf16>, vector<144x128xbf16>, vector<16x128xf32> -> vector<16x128xf32>
    %c0_3 = arith.constant 0 : index
    %c0_4 = arith.constant 0 : index
    %3 = vector.load %arg3[%c0_3, %c0_4] : memref<16x1xf32, #tpu.memory_space<vmem>>, vector<16x1xf32>
    %4 = vector.broadcast %3 : vector<16x1xf32> to vector<16x128xf32>
    %5 = arith.mulf %2, %4 : vector<16x128xf32>
    %c0_5 = arith.constant 0 : index
    %c0_6 = arith.constant 0 : index
    %6 = vector.load %arg4[%c0_5, %c0_6] : memref<16x1xf32, #tpu.memory_space<vmem>>, vector<16x1xf32>
    %7 = vector.broadcast %6 : vector<16x1xf32> to vector<16x128xf32>
    %8 = arith.addf %5, %7 : vector<16x128xf32>
    %cst_7 = arith.constant 0.000000e+00 : f32
    %9 = vector.broadcast %cst_7 : f32 to vector<16x128xf32>
    %10 = arith.maximumf %8, %9 : vector<16x128xf32>
    %11 = arith.truncf %10 : vector<16x128xf32> to vector<16x128xbf16>
    %c0_8 = arith.constant 0 : index
    %c0_9 = arith.constant 0 : index
    %12 = vector.load %arg5[%c0_8, %c0_9] : memref<16x128xbf16, #tpu.memory_space<vmem>>, vector<16x128xbf16>
    tpu.vector_store %arg5[%c0_8, %c0_9], %11 {strides = array<i32>} : memref<16x128xbf16, #tpu.memory_space<vmem>>, vector<16x128xbf16>,
    return
  }
  func.func @transform_0(%arg0: i32) -> (i32, i32) {
    %c0_i32 = arith.constant 0 : i32
    %c0_i32_0 = arith.constant 0 : i32
    %c0_i32_1 = arith.constant 0 : i32
    return %c0_i32, %c0_i32_0 : i32, i32
  }
  func.func @transform_1(%arg0: i32) -> (i32, i32) {
    %c0_i32 = arith.constant 0 : i32
    %c0_i32_0 = arith.constant 0 : i32
    return %c0_i32, %arg0 : i32, i32
  }
  func.func @transform_2(%arg0: i32) -> (i32, i32) {
    %c0_i32 = arith.constant 0 : i32
    %c0_i32_0 = arith.constant 0 : i32
    %c0_i32_1 = arith.constant 0 : i32
    return %c0_i32, %c0_i32_0 : i32, i32
  }
  func.func @transform_3(%arg0: i32) -> (i32, i32) {
    %c0_i32 = arith.constant 0 : i32
    %c0_i32_0 = arith.constant 0 : i32
    %c0_i32_1 = arith.constant 0 : i32
    return %c0_i32, %c0_i32_0 : i32, i32
  }
  func.func @transform_4(%arg0: i32) -> (i32, i32) {
    %c0_i32 = arith.constant 0 : i32
    %c0_i32_0 = arith.constant 0 : i32
    return %c0_i32, %arg0 : i32, i32
  }
}

module attributes {stable_mosaic.version = 11 : i64} {
  func.func @_matmul_affine_kernel(%arg0: i32, %arg1: memref<5x16xbf16, #tpu.memory_space<vmem>>, %arg2: memref<16x128xbf16, #tpu.memory_space<vmem>>, %arg3: memref<5x1xf32, #tpu.memory_space<vmem>>, %arg4: memref<5x1xf32, #tpu.memory_space<vmem>>, %arg5: memref<5x128xf32, #tpu.memory_space<vmem>>) attributes {dimension_semantics = [#tpu.dimension_semantics<parallel>], iteration_bounds = array<i64: 1>, scalar_prefetch = 0 : i64, scratch_operands = 0 : i64, tpu.core_type = #tpu.core_type<tc>, window_params = [{pipeline_mode = #tpu.pipeline_mode<synchronous>, transform_indices = @transform_0, window_bounds = array<i64: 5, 16>}, {transform_indices = @transform_1, window_bounds = array<i64: 16, 128>}, {pipeline_mode = #tpu.pipeline_mode<synchronous>, transform_indices = @transform_2, window_bounds = array<i64: 5, 1>}, {pipeline_mode = #tpu.pipeline_mode<synchronous>, transform_indices = @transform_3, window_bounds = array<i64: 5, 1>}, {transform_indices = @transform_4, window_bounds = array<i64: 5, 128>}]} {
    %c0 = arith.constant 0 : index
    %c0_0 = arith.constant 0 : index
    %0 = vector.load %arg1[%c0, %c0_0] : memref<5x16xbf16, #tpu.memory_space<vmem>>, vector<5x16xbf16>
    %c0_1 = arith.constant 0 : index
    %c0_2 = arith.constant 0 : index
    %1 = vector.load %arg2[%c0_1, %c0_2] : memref<16x128xbf16, #tpu.memory_space<vmem>>, vector<16x128xbf16>
    %cst = arith.constant dense<0.000000e+00> : vector<5x128xf32>
    %2 = tpu.matmul %0, %1, %cst {dimension_numbers = #tpu.dot_dimension_numbers<[1], [0], [0], [1], [0, 0, 1, 1], [], []>} : vector<5x16xbf16>, vector<16x128xbf16>, vector<5x128xf32> -> vector<5x128xf32>
    %c0_3 = arith.constant 0 : index
    %c0_4 = arith.constant 0 : index
    %3 = vector.load %arg3[%c0_3, %c0_4] : memref<5x1xf32, #tpu.memory_space<vmem>>, vector<5x1xf32>
    %4 = vector.broadcast %3 : vector<5x1xf32> to vector<5x128xf32>
    %5 = arith.mulf %2, %4 : vector<5x128xf32>
    %c0_5 = arith.constant 0 : index
    %c0_6 = arith.constant 0 : index
    %6 = vector.load %arg4[%c0_5, %c0_6] : memref<5x1xf32, #tpu.memory_space<vmem>>, vector<5x1xf32>
    %7 = vector.broadcast %6 : vector<5x1xf32> to vector<5x128xf32>
    %8 = arith.addf %5, %7 : vector<5x128xf32>
    %c0_7 = arith.constant 0 : index
    %c0_8 = arith.constant 0 : index
    %9 = vector.load %arg5[%c0_7, %c0_8] : memref<5x128xf32, #tpu.memory_space<vmem>>, vector<5x128xf32>
    tpu.vector_store %arg5[%c0_7, %c0_8], %8 {strides = array<i32>} : memref<5x128xf32, #tpu.memory_space<vmem>>, vector<5x128xf32>,
    return
  }
  func.func @transform_0(%arg0: i32) -> (i32, i32) {
    %c0_i32 = arith.constant 0 : i32
    %c0_i32_0 = arith.constant 0 : i32
    %c0_i32_1 = arith.constant 0 : i32
    return %c0_i32, %c0_i32_0 : i32, i32
  }
  func.func @transform_1(%arg0: i32) -> (i32, i32) {
    %c0_i32 = arith.constant 0 : i32
    %c0_i32_0 = arith.constant 0 : i32
    return %c0_i32, %arg0 : i32, i32
  }
  func.func @transform_2(%arg0: i32) -> (i32, i32) {
    %c0_i32 = arith.constant 0 : i32
    %c0_i32_0 = arith.constant 0 : i32
    %c0_i32_1 = arith.constant 0 : i32
    return %c0_i32, %c0_i32_0 : i32, i32
  }
  func.func @transform_3(%arg0: i32) -> (i32, i32) {
    %c0_i32 = arith.constant 0 : i32
    %c0_i32_0 = arith.constant 0 : i32
    %c0_i32_1 = arith.constant 0 : i32
    return %c0_i32, %c0_i32_0 : i32, i32
  }
  func.func @transform_4(%arg0: i32) -> (i32, i32) {
    %c0_i32 = arith.constant 0 : i32
    %c0_i32_0 = arith.constant 0 : i32
    return %c0_i32, %arg0 : i32, i32
  }
}

module attributes {stable_mosaic.version = 11 : i64} {
  func.func @_bilinear_kernel(%arg0: i32, %arg1: memref<64x1024xbf16, #tpu.memory_space<vmem>>, %arg2: memref<10x64xbf16, #tpu.memory_space<vmem>>, %arg3: memref<10x1024xf32, #tpu.memory_space<vmem>>) attributes {dimension_semantics = [#tpu.dimension_semantics<parallel>], iteration_bounds = array<i64: 1>, scalar_prefetch = 0 : i64, scratch_operands = 0 : i64, tpu.core_type = #tpu.core_type<tc>, window_params = [{pipeline_mode = #tpu.pipeline_mode<synchronous>, transform_indices = @transform_0, window_bounds = array<i64: 64, 1024>}, {transform_indices = @transform_1, window_bounds = array<i64: 10, 64>}, {transform_indices = @transform_2, window_bounds = array<i64: 10, 1024>}]} {
    %c0 = arith.constant 0 : index
    %c0_0 = arith.constant 0 : index
    %0 = vector.load %arg2[%c0, %c0_0] : memref<10x64xbf16, #tpu.memory_space<vmem>>, vector<10x64xbf16>
    %c0_1 = arith.constant 0 : index
    %c0_2 = arith.constant 0 : index
    %1 = vector.load %arg1[%c0_1, %c0_2] : memref<64x1024xbf16, #tpu.memory_space<vmem>>, vector<64x1024xbf16>
    %cst = arith.constant dense<0.000000e+00> : vector<10x1024xf32>
    %2 = tpu.matmul %0, %1, %cst {dimension_numbers = #tpu.dot_dimension_numbers<[1], [0], [0], [1], [0, 0, 1, 1], [], []>} : vector<10x64xbf16>, vector<64x1024xbf16>, vector<10x1024xf32> -> vector<10x1024xf32>
    %c0_3 = arith.constant 0 : index
    %c0_4 = arith.constant 0 : index
    %3 = vector.load %arg3[%c0_3, %c0_4] : memref<10x1024xf32, #tpu.memory_space<vmem>>, vector<10x1024xf32>
    tpu.vector_store %arg3[%c0_3, %c0_4], %2 {strides = array<i32>} : memref<10x1024xf32, #tpu.memory_space<vmem>>, vector<10x1024xf32>,
    return
  }
  func.func @transform_0(%arg0: i32) -> (i32, i32) {
    %c0_i32 = arith.constant 0 : i32
    %c0_i32_0 = arith.constant 0 : i32
    %c0_i32_1 = arith.constant 0 : i32
    return %c0_i32, %c0_i32_0 : i32, i32
  }
  func.func @transform_1(%arg0: i32) -> (i32, i32) {
    %c0_i32 = arith.constant 0 : i32
    %c0_i32_0 = arith.constant 0 : i32
    return %arg0, %c0_i32 : i32, i32
  }
  func.func @transform_2(%arg0: i32) -> (i32, i32) {
    %c0_i32 = arith.constant 0 : i32
    %c0_i32_0 = arith.constant 0 : i32
    return %arg0, %c0_i32 : i32, i32
  }
}

</mosaic_0001>

<bundles_post_ra>
// kernel: deeplab_forward.15
= control target key start
LH: loop header
LB: loop body
LE: loop exit
PB: predicated region body
PF: predicated region fallthrough
CT: control target
= control target key end

     0   :  { %s498_s15 = smov 0   ;;  %s500_s16 = smov 0   ;;  %s559_s0 = inlined_call_operand.vmem [shape: bf16[8,32], index: 0, kind: input, shape index: {}]   ;;  %s560_s1 = inlined_call_operand.vmem [shape: bf16[32,512], index: 1, kind: input, shape index: {}]   ;;  %s561_s2 = inlined_call_operand.vmem [shape: f32[8,1], index: 2, kind: input, shape index: {}]   ;;  %s562_s3 = inlined_call_operand.vmem [shape: f32[8,1], index: 3, kind: input, shape index: {}]   ;;  %s563_s4 = inlined_call_operand.vmem [shape: bf16[8,512], index: 4, kind: output, shape index: {}]  }
   0x1   :  { %s502_s17 = smov 0  }
   0x2 LB: > { %s386_s18 = sadd.s32 4294967295, %s470_s17   ;;  %s515_s19 = sadd.s32 1, %s470_s17   ;;  %s470_s17 = sphi %s502_s17, %s566_s17   ;;  %s466_s16 = sphi %s500_s16, %s565_s16   ;;  %s462_s15 = sphi %s498_s15, %s564_s15  }
   0x3   : > { %s39_s20 = ssub.s32 %s470_s17, %s515_s19  ;;  %s42_s21 = sadd.s32 1, %s466_s16 }
   0x4   : > { %p40_p0 = scmp.eq.s32.totalorder %s39_s20, 0  ;;  %p49_p1 = scmp.ne.s32.totalorder %s466_s16, %s462_s15 }
   0x5   : > { %p50_p2 = scmp.eq.s32.totalorder %s470_s17, 0  ;;  %p389_p4 = scmp.ge.s32.totalorder %s470_s17, 2 }
   0x6   : > { %s524_s22 = scalar_select %p40_p0, %s466_s16, %s42_s21  }
   0x7   : > { %p51_p3 = por %p50_p2, %p49_p1  ;;  %152 = sbr.rel (%p389_p4) target bundleno = 20 (0x14), region = 28 }
   0xc   : > { %155 = sbr.rel (!%p51_p3) target bundleno = 20 (0x14), region = 32  ;;  %s157_s23 = sand.u32 (%p51_p3), 1, %s466_s16  }
   0xd   : > { %s417_s24 = sshll.u32 (%p51_p3), %s470_s17, 3  ;;  %s390_s25 = sshll.u32 (%p51_p3), %s157_s23, 5 }
   0xe   : > { %s162_s28 = scalar_lea.vmem (%p51_p3), %s560_s1, %s417_s24  ;;  %s159_s29 = scalar_lea.vmem (%p51_p3), [#allocation2], %s390_s25 }
   0xf   : > { %v197_v0 = vld [vmem:[%s162_s28] sm:$0xff] (%p51_p3)  ;;  %v199_v1 = vld [vmem:[%s162_s28 + $0x10] sm:$0xff] (%p51_p3) }
  0x10   : > { %v201_v2 = vld [vmem:[%s162_s28 + $0x20] sm:$0xff] (%p51_p3)  ;;  %198 = vst [vmem:[%s159_s29] sm:$0xff] (%p51_p3), %v197_v0  ;;  %v203_v3 = vld [vmem:[%s162_s28 + $0x30] sm:$0xff] (%p51_p3) }
  0x11   : > { %200 = vst [vmem:[%s159_s29 + $0x8] sm:$0xff] %v199_v1 }
  0x12   : > { %202 = vst [vmem:[%s159_s29 + $0x10] sm:$0xff] %v201_v2 }
  0x13   : > { %204 = vst [vmem:[%s159_s29 + $0x18] sm:$0xff] %v203_v3 }
  0x14 PF: > { %p393_p5 = scmp.ge.s32.totalorder %s470_s17, 1  ;;  %p209_p6 = scmp.lt.s32.totalorder %s470_s17, 3 }
  0x16   : > { %p210_p7 = pnand %p393_p5, %p209_p6 }
  0x17   : > { %s216_s30 = sand.u32 (!%p210_p7), 1, %s462_s15   ;;  %s395_s13 = sshll.u32 (!%p210_p7), %s386_s18, 1 }
  0x18   : > { %213 = sbr.rel (%p210_p7) target bundleno = 175 (0xaf), region = 70  ;;  %s394_s7 = sshll.u32 (!%p210_p7), %s216_s30, 5 }
  0x19   : > { %s218_s8 = scalar_lea.vmem (!%p210_p7), [#allocation2], %s394_s7  ;;  %p243_p8 = scmp.lt.s32.totalorder (!%p210_p7), %s395_s13, 3 }
  0x1d   : > { %v304_v4 = vld [vmem:[%s561_s2] sm:$0xff]  ;;  %v472_v5 = vmov 0   ;;  %v407_v6 = vld [vmem:[%s218_s8 + $0x10] sm:$0xf]  ;;  %v421_v7 = vld [vmem:[%s218_s8 + $0x14] sm:$0xf0] }
  0x1e   : > { %447 = vset.pattern.permute.xlu0 %v472_v5  ;;  %v420_v8 = vld [vmem:[%s218_s8 + $0x14] sm:$0xf]  ;;  %v408_v9 = vor.u32 %v421_v7, %v407_v6  ;;  %v409_v10 = vld [vmem:[%s218_s8 + $0x18] sm:$0xf0]  ;;  %v399_v11 = vld [vmem:[%s218_s8] sm:$0xf] }
  0x1f   : > { %307 = vperm.xlu0 %447, %v304_v4   ;;  %v419_v12 = vld [vmem:[%s218_s8 + $0x4] sm:$0xf0]  ;;  %v412_v13 = vor.u32 %v420_v8, %v409_v10  ;;  %v418_v14 = vld [vmem:[%s218_s8 + $0x4] sm:$0xf]  ;;  %v401_v15 = vld [vmem:[%s218_s8 + $0x8] sm:$0xf0] }
  0x20   : > { %284 = vmatpush.bf16.msra.mxu0 %v408_v9  ;;  %v400_v16 = vor.u32 %v419_v12, %v399_v11  ;;  %v404_v17 = vor.u32 %v418_v14, %v401_v15  ;;  %v312_v18 = vld [vmem:[%s562_s3] sm:$0xff]  ;;  %vm274_vm0 = vcmask 261120   ;;  %s568_s13 = smov (!%p243_p8, %s395_s13), 3 }
  0x21   : > { %297 = vmatpush.bf16.msra.mxu1 %v412_v13  ;;  %v249_v19 = vld [vmem:[%s559_s0] sm:$0xf]  ;;  %s396_s14 = sshll.u32 %s568_s13, 2 }
  0x22   : > { %s246_s21 = scalar_lea.vmem %s563_s4, %s396_s14 }
  0x24   : > { %285 = vmatpush.bf16.msra.mxu0 %v400_v16 }
  0x25   : > { %298 = vmatpush.bf16.msra.mxu1 %v404_v17 }
  0x27   : > { %315 = vperm.xlu0 %447, %v312_v18   ;;  %413 = vmatmul.msk.bf16.vlgmr.msra.gmra.mxu0 %vm274_vm0, %v249_v19 }
  0x28   : > { %414 = vmatmul.msk.bf16.vlgmr.msra.gmra.mxu1 %vm274_vm0, %v249_v19 }
  0x91   : > { %v308_v20 = vpop.permute.xlu0 %307 }
  0x99   : > { %v316_v24 = vpop.permute.xlu0 %315 }
  0xa4   : > { %v287_v21 = vpop.f32.mrf.mxu0 }
  0xa5   : > { %v310_v22 = vmul.f32 %v308_v20, %v287_v21  ;;  %v300_v23 = vpop.f32.mrf.mxu1 }
  0xa6   : > { %v311_v25 = vmul.f32 %v308_v20, %v300_v23 }
  0xa7   : > { %v318_v26 = vadd.f32 %v316_v24, %v310_v22 }
  0xa8   : > { %v319_v27 = vadd.f32 %v316_v24, %v311_v25 }
  0xa9   : > { %v320_v28 = vmax.f32 %v318_v26, 0.0 }
  0xaa   : > { %v321_v29 = vmax.f32 %v319_v27, 0.0 }
  0xac   : > { %v322_v30 = vpack.c.bf16 %v321_v29, %v320_v28  ;;  %v289_v31 = vpop.f32.mrf.mxu0 }
  0xad   : > { %v302_v32 = vpop.f32.mrf.mxu1 }
  0xae   : > { %323 = vst [vmem:[%s246_s21] sm:$0xff] %v322_v30 }
  0xaf PF: > { %p11_p9 = scmp.ge.s32.totalorder %s515_s19, 4   ;;  %s564_s15 = smov %s466_s16 }
  0xb0   : > { %s565_s16 = smov %s524_s22  ;;  %s566_s17 = smov %s515_s19 }
  0xb1   :  { %13 = sbr.rel (!%p11_p9) target bundleno = 2 (0x2), region = 109 }

// kernel: deeplab_forward.16
= control target key start
LH: loop header
LB: loop body
LE: loop exit
PB: predicated region body
PF: predicated region fallthrough
CT: control target
= control target key end

     0   :  { %v160_v1 = vmov 0   ;;  %vm65_vm0 = vcmask 654336   ;;  %s219_s1 = inlined_call_operand.vmem [shape: bf16[80,128], index: 1, kind: input, shape index: {}]   ;;  %s220_s2 = inlined_call_operand.vmem [shape: f32[16,1], index: 2, kind: input, shape index: {}]   ;;  %s221_s3 = inlined_call_operand.vmem [shape: f32[16,1], index: 3, kind: input, shape index: {}]   ;;  %s222_s0 = inlined_call_operand.vmem [shape: bf16[16,80], index: 0, kind: input, shape index: {}]   ;;  %s223_s4 = inlined_call_operand.vmem [shape: bf16[16,128], index: 4, kind: output, shape index: {}]  }
   0x1   :  { %v151_v0 = vld [vmem:[%s219_s1 + $0x20] sm:$0xff]  ;;  %158 = vset.pattern.permute.xlu0 %v160_v1  ;;  %159 = vset.pattern.permute.xlu1 %v160_v1  ;;  %v150_v2 = vld [vmem:[%s219_s1 + $0x18] sm:$0xff]  ;;  %v149_v5 = vld [vmem:[%s219_s1 + $0x10] sm:$0xff] }
   0x2   :  { %72 = vmatpush.bf16.msra.mxu0 %v151_v0  ;;  %v83_v3 = vld [vmem:[%s220_s2] sm:$0xff]  ;;  %v84_v6 = vld [vmem:[%s220_s2 + $0x8] sm:$0xff] }
   0x3   :  { %v97_v4 = vld [vmem:[%s221_s3] sm:$0xff]  ;;  %87 = vperm.xlu0 %158, %v83_v3   ;;  %v98_v7 = vld [vmem:[%s221_s3 + $0x8] sm:$0xff] }
   0x4   :  { %101 = vperm.xlu1 %159, %v97_v4   ;;  %v148_v8 = vld [vmem:[%s219_s1 + $0x8] sm:$0xff]  ;;  %v147_v9 = vld [vmem:[%s219_s1] sm:$0xff] }
   0x5   :  { %v146_v10 = vld [vmem:[%s222_s0] sm:$0xff] }
   0x6   :  { %73 = vmatpush.bf16.msra.mxu0 %v150_v2 }
   0xa   :  { %74 = vmatpush.bf16.msra.mxu0 %v149_v5 }
   0xb   :  { %92 = vperm.xlu0 %158, %v84_v6  }
   0xc   :  { %106 = vperm.xlu1 %159, %v98_v7  }
   0xe   :  { %75 = vmatpush.bf16.msra.mxu0 %v148_v8 }
  0x12   :  { %76 = vmatpush.bf16.msra.mxu0 %v147_v9 }
  0x15   :  { %145 = vmatmul.msk.bf16.vlgmr.msra.gmra.mxu0 %vm65_vm0, %v146_v10 }
  0x75   :  { %v88_v11 = vpop.permute.xlu0 %87 }
  0x76   :  { %v102_v12 = vpop.permute.xlu1 %101 }
  0x7d   :  { %v93_v15 = vpop.permute.xlu0 %92 }
  0x7e   :  { %v107_v19 = vpop.permute.xlu1 %106 }
  0x92   :  { %v78_v13 = vpop.f32.mrf.mxu0 }
  0x93   :  { %v95_v14 = vmul.f32 %v88_v11, %v78_v13 }
  0x95   :  { %v109_v17 = vadd.f32 %v102_v12, %v95_v14 }
  0x97   :  { %v111_v21 = vmax.f32 %v109_v17, 0.0 }
  0x9a   :  { %v80_v16 = vpop.f32.mrf.mxu0 }
  0x9b   :  { %v96_v18 = vmul.f32 %v93_v15, %v80_v16 }
  0x9d   :  { %v110_v20 = vadd.f32 %v107_v19, %v96_v18 }
  0x9f   :  { %v112_v22 = vmax.f32 %v110_v20, 0.0 }
  0xa1   :  { %v155_v23 = vpack.c.bf16 %v112_v22, %v111_v21 }
  0xa3   :  { %156 = vst [vmem:[%s223_s4] sm:$0xff] %v155_v23  }

// kernel: deeplab_forward.17
= control target key start
LH: loop header
LB: loop body
LE: loop exit
PB: predicated region body
PF: predicated region fallthrough
CT: control target
= control target key end

     0   :  { %v319_v1 = vmov 0   ;;  %vm112_vm0 = vcmask 130048   ;;  %s428_s1 = inlined_call_operand.vmem [shape: bf16[144,128], index: 1, kind: input, shape index: {}]   ;;  %s429_s0 = inlined_call_operand.vmem [shape: bf16[32,144], index: 0, kind: input, shape index: {}]   ;;  %s430_s2 = inlined_call_operand.vmem [shape: f32[32,1], index: 2, kind: input, shape index: {}]   ;;  %s431_s3 = inlined_call_operand.vmem [shape: f32[32,1], index: 3, kind: input, shape index: {}]   ;;  %s432_s4 = inlined_call_operand.vmem [shape: bf16[32,128], index: 4, kind: output, shape index: {}]  }
   0x1   :  { %v294_v0 = vld [vmem:[%s428_s1 + $0x38] sm:$0xff]  ;;  %317 = vset.pattern.permute.xlu1 %v319_v1  ;;  %316 = vset.pattern.permute.xlu0 %v319_v1  ;;  %v295_v2 = vld [vmem:[%s428_s1 + $0x40] sm:$0xff]  ;;  %v293_v4 = vld [vmem:[%s428_s1 + $0x30] sm:$0xff] }
   0x2   :  { %v283_v3 = vld [vmem:[%s429_s0 + $0x4] sm:$0xf]  ;;  %318 = vset.pattern.permute.xlu2 %v319_v1  ;;  %119 = vmatpush.bf16.msra.mxu0 %v294_v0  ;;  %v233_v5 = vld [vmem:[%s429_s0 + $0x8] sm:$0xf0]  ;;  %v159_v7 = vld [vmem:[%s430_s2 + $0x10] sm:$0xff] }
   0x3   :  { %307 = vmatpush.bf16.msra.mxu2 %v294_v0  ;;  %145 = vmatpush.bf16.msra.mxu1 %v295_v2  ;;  %v236_v6 = vor.u32 %v283_v3, %v233_v5  ;;  %v157_v8 = vld [vmem:[%s430_s2] sm:$0xff]  ;;  %v292_v9 = vld [vmem:[%s428_s1 + $0x28] sm:$0xff]  ;;  %v160_v11 = vld [vmem:[%s430_s2 + $0x18] sm:$0xff] }
   0x4   :  { %173 = vperm.xlu1 %317, %v159_v7   ;;  %163 = vperm.xlu0 %316, %v157_v8   ;;  %v185_v10 = vld [vmem:[%s431_s3] sm:$0xff]  ;;  %v158_v12 = vld [vmem:[%s430_s2 + $0x8] sm:$0xff]  ;;  %v290_v15 = vld [vmem:[%s428_s1 + $0x18] sm:$0xff] }
   0x5   :  { %191 = vperm.xlu2 %318, %v185_v10   ;;  %v291_v13 = vld [vmem:[%s428_s1 + $0x20] sm:$0xff]  ;;  %v186_v14 = vld [vmem:[%s431_s3 + $0x8] sm:$0xff]  ;;  %v285_v16 = vld [vmem:[%s429_s0 + $0x14] sm:$0xf] }
   0x6   :  { %120 = vmatpush.bf16.msra.mxu0 %v293_v4  ;;  %281 = vmatmul.msk.bf16.vlgmr.msra.gmra.mxu1 %vm112_vm0, %v236_v6  ;;  %v241_v17 = vld [vmem:[%s429_s0 + $0x18] sm:$0xf0]  ;;  %v187_v19 = vld [vmem:[%s431_s3 + $0x10] sm:$0xff]  ;;  %v288_v22 = vld [vmem:[%s428_s1 + $0x8] sm:$0xff] }
   0x7   :  { %308 = vmatpush.bf16.msra.mxu2 %v293_v4  ;;  %v188_v18 = vld [vmem:[%s431_s3 + $0x18] sm:$0xff]  ;;  %v289_v20 = vld [vmem:[%s428_s1 + $0x10] sm:$0xff]  ;;  %v244_v21 = vor.u32 %v285_v16, %v241_v17  ;;  %v287_v23 = vld [vmem:[%s428_s1] sm:$0xff] }
   0x8   :  { %v231_v24 = vld [vmem:[%s429_s0] sm:$0xf]  ;;  %v284_v25 = vld [vmem:[%s429_s0 + $0x4] sm:$0xf0]  ;;  %v239_v26 = vld [vmem:[%s429_s0 + $0x10] sm:$0xf] }
   0x9   :  { %v286_v27 = vld [vmem:[%s429_s0 + $0x14] sm:$0xf0]  ;;  %v232_v28 = vor.u32 %v284_v25, %v231_v24 }
   0xa   :  { %121 = vmatpush.bf16.msra.mxu0 %v292_v9  ;;  %v240_v29 = vor.u32 %v286_v27, %v239_v26 }
   0xb   :  { %309 = vmatpush.bf16.msra.mxu2 %v292_v9 }
   0xc   :  { %178 = vperm.xlu1 %317, %v160_v11   ;;  %168 = vperm.xlu0 %316, %v158_v12  }
   0xd   :  { %196 = vperm.xlu2 %318, %v186_v14  }
   0xe   :  { %122 = vmatpush.bf16.msra.mxu0 %v291_v13 }
   0xf   :  { %310 = vmatpush.bf16.msra.mxu2 %v291_v13 }
  0x12   :  { %123 = vmatpush.bf16.msra.mxu0 %v290_v15 }
  0x13   :  { %311 = vmatpush.bf16.msra.mxu2 %v290_v15 }
  0x14   :  { %206 = vperm.xlu1 %317, %v188_v18   ;;  %201 = vperm.xlu0 %316, %v187_v19  }
  0x16   :  { %124 = vmatpush.bf16.msra.mxu0 %v289_v20  ;;  %282 = vmatmul.msk.bf16.gmra.mxu1 %vm112_vm0, %v244_v21 }
  0x17   :  { %312 = vmatpush.bf16.msra.mxu2 %v289_v20 }
  0x1a   :  { %125 = vmatpush.bf16.msra.mxu0 %v288_v22 }
  0x1b   :  { %313 = vmatpush.bf16.msra.mxu2 %v288_v22 }
  0x1e   :  { %126 = vmatpush.bf16.msra.mxu0 %v287_v23 }
  0x1f   :  { %314 = vmatpush.bf16.msra.mxu2 %v287_v23 }
  0x21   :  { %127 = vmatmul.bf16.vlgmr.msra.gmra.mxu0 %v232_v28 }
  0x22   :  { %132 = vmatmul.bf16.vlgmr.msra.gmra.mxu2 %v240_v29 }
  0x5f   :  { %v192_v35 = vpop.permute.xlu2 %191 }
  0x67   :  { %v197_v47 = vpop.permute.xlu2 %196 }
  0x76   :  { %v164_v32 = vpop.permute.xlu0 %163  ;;  %v174_v33 = vpop.permute.xlu1 %173 }
  0x7e   :  { %v169_v38 = vpop.permute.xlu0 %168  ;;  %v179_v41 = vpop.permute.xlu1 %178 }
  0x83   :  { %v147_v30 = vpop.f32.mrf.mxu1 }
  0x86   :  { %v202_v55 = vpop.permute.xlu0 %201  ;;  %v207_v59 = vpop.permute.xlu1 %206 }
  0x8b   :  { %v149_v31 = vpop.f32.mrf.mxu1 }
  0x93   :  { %v152_v37 = vpop.f32.mrf.mxu1 }
  0x9b   :  { %v154_v50 = vpop.f32.mrf.mxu1 }
  0x9e   :  { %v128_v34 = vpop.f32.mrf.mxu0 }
  0x9f   :  { %v148_v36 = vadd.f32 %v147_v30, %v128_v34 }
  0xa1   :  { %v181_v40 = vmul.f32 %v164_v32, %v148_v36 }
  0xa3   :  { %v209_v45 = vadd.f32 %v192_v35, %v181_v40 }
  0xa5   :  { %v133_v39 = vpop.f32.mrf.mxu2  ;;  %v213_v52 = vmax.f32 %v209_v45, 0.0 }
  0xa6   :  { %v130_v42 = vpop.f32.mrf.mxu0  ;;  %v153_v43 = vadd.f32 %v152_v37, %v133_v39 }
  0xa7   :  { %v150_v44 = vadd.f32 %v149_v31, %v130_v42 }
  0xa8   :  { %v183_v48 = vmul.f32 %v174_v33, %v153_v43 }
  0xa9   :  { %v182_v46 = vmul.f32 %v169_v38, %v150_v44 }
  0xaa   :  { %v211_v56 = vadd.f32 %v202_v55, %v183_v48 }
  0xab   :  { %v210_v49 = vadd.f32 %v197_v47, %v182_v46 }
  0xac   :  { %v215_v61 = vmax.f32 %v211_v56, 0.0 }
  0xad   :  { %v135_v51 = vpop.f32.mrf.mxu2  ;;  %v214_v53 = vmax.f32 %v210_v49, 0.0 }
  0xae   :  { %v155_v54 = vadd.f32 %v154_v50, %v135_v51 }
  0xaf   :  { %v299_v57 = vpack.c.bf16 %v214_v53, %v213_v52 }
  0xb0   :  { %v184_v58 = vmul.f32 %v179_v41, %v155_v54 }
  0xb1   :  { %300 = vst [vmem:[%s432_s4] sm:$0xff] %v299_v57  }
  0xb2   :  { %v212_v60 = vadd.f32 %v207_v59, %v184_v58 }
  0xb4   :  { %v216_v62 = vmax.f32 %v212_v60, 0.0 }
  0xb6   :  { %v304_v63 = vpack.c.bf16 %v216_v62, %v215_v61 }
  0xb8   :  { %306 = vst [vmem:[%s432_s4 + $0x8] sm:$0xff] %v304_v63  }

// kernel: deeplab_forward.19
= control target key start
LH: loop header
LB: loop body
LE: loop exit
PB: predicated region body
PF: predicated region fallthrough
CT: control target
= control target key end

     0   :  { %v379_v5 = vmov 0   ;;  %vm181_vm0 = vcmask 261120   ;;  %s492_s1 = inlined_call_operand.vmem [shape: bf16[288,128], index: 1, kind: input, shape index: {}]   ;;  %s493_s0 = inlined_call_operand.vmem [shape: bf16[16,288], index: 0, kind: input, shape index: {}]   ;;  %s494_s2 = inlined_call_operand.vmem [shape: f32[16,1], index: 2, kind: input, shape index: {}]   ;;  %s495_s3 = inlined_call_operand.vmem [shape: f32[16,1], index: 3, kind: input, shape index: {}]   ;;  %s496_s4 = inlined_call_operand.vmem [shape: bf16[16,128], index: 4, kind: output, shape index: {}]  }
   0x1   :  { %v360_v0 = vld [vmem:[%s492_s1 + $0x38] sm:$0xff]  ;;  %v359_v2 = vld [vmem:[%s492_s1 + $0x30] sm:$0xff]  ;;  %v370_v4 = vld [vmem:[%s492_s1 + $0x88] sm:$0xff]  ;;  %377 = vset.pattern.permute.xlu0 %v379_v5  ;;  %378 = vset.pattern.permute.xlu1 %v379_v5 }
   0x2   :  { %v368_v1 = vld [vmem:[%s492_s1 + $0x78] sm:$0xff]  ;;  %185 = vmatpush.bf16.msra.mxu0 %v360_v0  ;;  %v367_v3 = vld [vmem:[%s492_s1 + $0x70] sm:$0xff]  ;;  %219 = vmatpush.bf16.msra.mxu2 %v370_v4  ;;  %v369_v6 = vld [vmem:[%s492_s1 + $0x80] sm:$0xff] }
   0x3   :  { %199 = vmatpush.bf16.msra.mxu1 %v368_v1  ;;  %v275_v7 = vld [vmem:[%s493_s0 + $0x8] sm:$0xf]  ;;  %v352_v8 = vld [vmem:[%s493_s0 + $0x10] sm:$0xf0]  ;;  %v227_v12 = vld [vmem:[%s494_s2] sm:$0xff] }
   0x4   :  { %v358_v9 = vld [vmem:[%s492_s1 + $0x28] sm:$0xff]  ;;  %v276_v11 = vor.u32 %v352_v8, %v275_v7  ;;  %v241_v13 = vld [vmem:[%s495_s3] sm:$0xff]  ;;  %231 = vperm.xlu0 %377, %v227_v12   ;;  %v356_v16 = vld [vmem:[%s492_s1 + $0x18] sm:$0xff] }
   0x5   :  { %v366_v10 = vld [vmem:[%s492_s1 + $0x68] sm:$0xff]  ;;  %245 = vperm.xlu1 %378, %v241_v13   ;;  %v357_v14 = vld [vmem:[%s492_s1 + $0x20] sm:$0xff]  ;;  %v364_v17 = vld [vmem:[%s492_s1 + $0x58] sm:$0xff] }
   0x6   :  { %186 = vmatpush.bf16.msra.mxu0 %v359_v2  ;;  %220 = vmatpush.bf16.msra.mxu2 %v369_v6  ;;  %v365_v15 = vld [vmem:[%s492_s1 + $0x60] sm:$0xff]  ;;  %v228_v18 = vld [vmem:[%s494_s2 + $0x8] sm:$0xff]  ;;  %v355_v20 = vld [vmem:[%s492_s1 + $0x10] sm:$0xff] }
   0x7   :  { %200 = vmatpush.bf16.msra.mxu1 %v367_v3  ;;  %v242_v19 = vld [vmem:[%s495_s3 + $0x8] sm:$0xff]  ;;  %v363_v21 = vld [vmem:[%s492_s1 + $0x50] sm:$0xff]  ;;  %v353_v24 = vld [vmem:[%s492_s1] sm:$0xff] }
   0x8   :  { %v354_v22 = vld [vmem:[%s492_s1 + $0x8] sm:$0xff]  ;;  %v361_v25 = vld [vmem:[%s492_s1 + $0x40] sm:$0xff]  ;;  %v269_v29 = vld [vmem:[%s493_s0 + $0xc] sm:$0xf0] }
   0x9   :  { %349 = vmatmul.msk.bf16.vlgmr.msra.gmra.mxu2 %vm181_vm0, %v276_v11  ;;  %v362_v23 = vld [vmem:[%s492_s1 + $0x48] sm:$0xff]  ;;  %v267_v26 = vld [vmem:[%s493_s0] sm:$0xf]  ;;  %v350_v28 = vld [vmem:[%s493_s0 + $0x4] sm:$0xf] }
   0xa   :  { %187 = vmatpush.bf16.msra.mxu0 %v358_v9  ;;  %v351_v27 = vld [vmem:[%s493_s0 + $0x8] sm:$0xf0]  ;;  %v272_v31 = vor.u32 %v350_v28, %v269_v29 }
   0xb   :  { %201 = vmatpush.bf16.msra.mxu1 %v366_v10  ;;  %v268_v30 = vor.u32 %v351_v27, %v267_v26 }
   0xc   :  { %236 = vperm.xlu0 %377, %v228_v18  }
   0xd   :  { %250 = vperm.xlu1 %378, %v242_v19  }
   0xe   :  { %188 = vmatpush.bf16.msra.mxu0 %v357_v14 }
   0xf   :  { %202 = vmatpush.bf16.msra.mxu1 %v365_v15 }
  0x12   :  { %189 = vmatpush.bf16.msra.mxu0 %v356_v16 }
  0x13   :  { %203 = vmatpush.bf16.msra.mxu1 %v364_v17 }
  0x16   :  { %190 = vmatpush.bf16.msra.mxu0 %v355_v20 }
  0x17   :  { %204 = vmatpush.bf16.msra.mxu1 %v363_v21 }
  0x1a   :  { %191 = vmatpush.bf16.msra.mxu0 %v354_v22 }
  0x1b   :  { %205 = vmatpush.bf16.msra.mxu1 %v362_v23 }
  0x1e   :  { %192 = vmatpush.bf16.msra.mxu0 %v353_v24 }
  0x1f   :  { %206 = vmatpush.bf16.msra.mxu1 %v361_v25 }
  0x21   :  { %193 = vmatmul.bf16.vlgmr.msra.gmra.mxu0 %v268_v30 }
  0x22   :  { %207 = vmatmul.bf16.vlgmr.msra.gmra.mxu1 %v272_v31 }
  0x76   :  { %v232_v36 = vpop.permute.xlu0 %231 }
  0x77   :  { %v246_v37 = vpop.permute.xlu1 %245 }
  0x7e   :  { %v237_v45 = vpop.permute.xlu0 %236 }
  0x7f   :  { %v251_v48 = vpop.permute.xlu1 %250 }
  0x8c   :  { %v222_v32 = vpop.f32.mrf.mxu2 }
  0x94   :  { %v224_v43 = vpop.f32.mrf.mxu2 }
  0x9e   :  { %v194_v33 = vpop.f32.mrf.mxu0 }
  0x9f   :  { %v208_v34 = vpop.f32.mrf.mxu1 }
  0xa0   :  { %v209_v35 = vadd.f32 %v208_v34, %v194_v33 }
  0xa2   :  { %v223_v38 = vadd.f32 %v222_v32, %v209_v35 }
  0xa4   :  { %v239_v41 = vmul.f32 %v232_v36, %v223_v38 }
  0xa6   :  { %v196_v39 = vpop.f32.mrf.mxu0  ;;  %v253_v46 = vadd.f32 %v246_v37, %v239_v41 }
  0xa7   :  { %v210_v40 = vpop.f32.mrf.mxu1 }
  0xa8   :  { %v211_v42 = vadd.f32 %v210_v40, %v196_v39  ;;  %v255_v50 = vmax.f32 %v253_v46, 0.0 }
  0xaa   :  { %v225_v44 = vadd.f32 %v224_v43, %v211_v42 }
  0xac   :  { %v240_v47 = vmul.f32 %v237_v45, %v225_v44 }
  0xae   :  { %v254_v49 = vadd.f32 %v251_v48, %v240_v47 }
  0xb0   :  { %v256_v51 = vmax.f32 %v254_v49, 0.0 }
  0xb2   :  { %v374_v52 = vpack.c.bf16 %v256_v51, %v255_v50 }
  0xb4   :  { %375 = vst [vmem:[%s496_s4] sm:$0xff] %v374_v52  }

// kernel: deeplab_forward.18
= control target key start
LH: loop header
LB: loop body
LE: loop exit
PB: predicated region body
PF: predicated region fallthrough
CT: control target
= control target key end

     0   :  { %v121_v1 = vmov 0   ;;  %vm41_vm0 = vcmask 261120   ;;  %s171_s1 = inlined_call_operand.vmem [shape: bf16[32,128], index: 1, kind: input, shape index: {}]   ;;  %s172_s2 = inlined_call_operand.vmem [shape: f32[16,1], index: 2, kind: input, shape index: {}]   ;;  %s173_s3 = inlined_call_operand.vmem [shape: f32[16,1], index: 3, kind: input, shape index: {}]   ;;  %s174_s0 = inlined_call_operand.vmem [shape: bf16[16,32], index: 0, kind: input, shape index: {}]   ;;  %s175_s4 = inlined_call_operand.vmem [shape: bf16[16,128], index: 4, kind: output, shape index: {}]  }
   0x1   :  { %v112_v0 = vld [vmem:[%s171_s1 + $0x8] sm:$0xff]  ;;  %119 = vset.pattern.permute.xlu0 %v121_v1  ;;  %120 = vset.pattern.permute.xlu1 %v121_v1  ;;  %v59_v2 = vld [vmem:[%s172_s2] sm:$0xff] }
   0x2   :  { %v73_v3 = vld [vmem:[%s173_s3] sm:$0xff]  ;;  %51 = vmatpush.bf16.msra.mxu0 %v112_v0  ;;  %63 = vperm.xlu0 %119, %v59_v2   ;;  %v60_v6 = vld [vmem:[%s172_s2 + $0x8] sm:$0xff] }
   0x3   :  { %v111_v4 = vld [vmem:[%s171_s1] sm:$0xff]  ;;  %77 = vperm.xlu1 %120, %v73_v3   ;;  %v74_v7 = vld [vmem:[%s173_s3 + $0x8] sm:$0xff] }
   0x4   :  { %v110_v5 = vld [vmem:[%s174_s0] sm:$0xff] }
   0x6   :  { %52 = vmatpush.bf16.msra.mxu0 %v111_v4 }
   0x9   :  { %109 = vmatmul.msk.bf16.vlgmr.msra.gmra.mxu0 %vm41_vm0, %v110_v5 }
   0xa   :  { %68 = vperm.xlu0 %119, %v60_v6  }
   0xb   :  { %82 = vperm.xlu1 %120, %v74_v7  }
  0x74   :  { %v64_v8 = vpop.permute.xlu0 %63 }
  0x75   :  { %v78_v9 = vpop.permute.xlu1 %77 }
  0x7c   :  { %v69_v12 = vpop.permute.xlu0 %68 }
  0x7d   :  { %v83_v16 = vpop.permute.xlu1 %82 }
  0x86   :  { %v54_v10 = vpop.f32.mrf.mxu0 }
  0x87   :  { %v71_v11 = vmul.f32 %v64_v8, %v54_v10 }
  0x89   :  { %v85_v14 = vadd.f32 %v78_v9, %v71_v11 }
  0x8b   :  { %v87_v18 = vmax.f32 %v85_v14, 0.0 }
  0x8e   :  { %v56_v13 = vpop.f32.mrf.mxu0 }
  0x8f   :  { %v72_v15 = vmul.f32 %v69_v12, %v56_v13 }
  0x91   :  { %v86_v17 = vadd.f32 %v83_v16, %v72_v15 }
  0x93   :  { %v88_v19 = vmax.f32 %v86_v17, 0.0 }
  0x95   :  { %v116_v20 = vpack.c.bf16 %v88_v19, %v87_v18 }
  0x97   :  { %117 = vst [vmem:[%s175_s4] sm:$0xff] %v116_v20  }

// kernel: deeplab_forward.22
= control target key start
LH: loop header
LB: loop body
LE: loop exit
PB: predicated region body
PF: predicated region fallthrough
CT: control target
= control target key end

     0   :  { %vm94_vm0 = vcmask 123904   ;;  %vm21_vm1 = vcmask 15360   ;;  %vm257_vm2 = vcmask 1041409   ;;  %vm259_vm3 = vcmask 1042434   ;;  %s674_s0 = inlined_call_operand.vmem [shape: bf16[32,2,16], index: 0, kind: input, shape index: {}]   ;;  %s675_s2 = inlined_call_operand.vmem [shape: f32[16,1], index: 2, kind: input, shape index: {}]   ;;  %s676_s3 = inlined_call_operand.vmem [shape: f32[16,1], index: 3, kind: input, shape index: {}]   ;;  %s677_s1 = inlined_call_operand.vmem [shape: f32[16,32], index: 1, kind: input, shape index: {}]   ;;  %s678_s4 = inlined_call_operand.vmem [shape: bf16[16,2], index: 4, kind: output, shape index: {}]  }
   0x1   :  { %v56_v0 = vld [vmem:[%s674_s0 + $0x1a] sm:$0x1]  ;;  %v54_v1 = vld [vmem:[%s674_s0 + $0x18] sm:$0x1]  ;;  %v47_v2 = vld [vmem:[%s674_s0 + $0x11] sm:$0x1] }
   0x2   :  { %v88_v3 = vunpack.c.l.bf16 %v56_v0  ;;  %v86_v4 = vunpack.c.l.bf16 %v54_v1  ;;  %v79_v5 = vunpack.c.l.bf16 %v47_v2  ;;  %v55_v6 = vld [vmem:[%s674_s0 + $0x19] sm:$0x1]  ;;  %v46_v7 = vld [vmem:[%s674_s0 + $0x10] sm:$0x1]  ;;  %v57_v11 = vld [vmem:[%s674_s0 + $0x1b] sm:$0x1] }
   0x3   :  { %v87_v12 = vunpack.c.l.bf16 %v55_v6  ;;  %v78_v13 = vunpack.c.l.bf16 %v46_v7  ;;  %v89_v14 = vunpack.c.l.bf16 %v57_v11  ;;  %v48_v18 = vld [vmem:[%s674_s0 + $0x12] sm:$0x1]  ;;  %v58_v19 = vld [vmem:[%s674_s0 + $0x1c] sm:$0x1]  ;;  %v38_v20 = vld [vmem:[%s674_s0 + $0x8] sm:$0x1] }
   0x4   :  { %v173_v8 = vsel %vm94_vm0, %v88_v3, 0.0  ;;  %v167_v9 = vsel %vm94_vm0, %v86_v4, 0.0  ;;  %v146_v10 = vsel %vm94_vm0, %v79_v5, 0.0  ;;  %v80_v21 = vunpack.c.l.bf16 %v48_v18  ;;  %v49_v27 = vld [vmem:[%s674_s0 + $0x13] sm:$0x1] }
   0x5   :  { %174 = vadd.xlane.f32.xlu1 %v173_v8  ;;  %168 = vadd.xlane.f32.xlu0 %v167_v9  ;;  %v170_v15 = vsel %vm94_vm0, %v87_v12, 0.0  ;;  %v143_v16 = vsel %vm94_vm0, %v78_v13, 0.0  ;;  %v176_v17 = vsel %vm94_vm0, %v89_v14, 0.0  ;;  %v90_v22 = vunpack.c.l.bf16 %v58_v19  ;;  %v39_v28 = vld [vmem:[%s674_s0 + $0x9] sm:$0x1] }
   0x6   :  { %147 = vadd.xlane.f32.xlu2 %v146_v10  ;;  %v70_v23 = vunpack.c.l.bf16 %v38_v20  ;;  %v149_v24 = vsel %vm94_vm0, %v80_v21, 0.0  ;;  %v59_v29 = vld [vmem:[%s674_s0 + $0x1d] sm:$0x1]  ;;  %v81_v30 = vunpack.c.l.bf16 %v49_v27  ;;  %v71_v31 = vunpack.c.l.bf16 %v39_v28  ;;  %v50_v36 = vld [vmem:[%s674_s0 + $0x14] sm:$0x1] }
   0x7   :  { %v179_v25 = vsel %vm94_vm0, %v90_v22, 0.0  ;;  %v91_v32 = vunpack.c.l.bf16 %v59_v29  ;;  %v40_v37 = vld [vmem:[%s674_s0 + $0xa] sm:$0x1]  ;;  %v60_v38 = vld [vmem:[%s674_s0 + $0x1e] sm:$0x1]  ;;  %v82_v39 = vunpack.c.l.bf16 %v50_v36  ;;  %vm261_vm4 = vcmask 1043459  }
   0x8   :  { %v119_v26 = vsel %vm94_vm0, %v70_v23, 0.0  ;;  %v152_v33 = vsel %vm94_vm0, %v81_v30, 0.0  ;;  %v122_v34 = vsel %vm94_vm0, %v71_v31, 0.0  ;;  %v72_v40 = vunpack.c.l.bf16 %v40_v37  ;;  %v34_v41 = vld [vmem:[%s674_s0 + $0x4] sm:$0x1] }
   0x9   :  { %v182_v35 = vsel %vm94_vm0, %v91_v32, 0.0  ;;  %v92_v42 = vunpack.c.l.bf16 %v60_v38  ;;  %v66_v43 = vunpack.c.l.bf16 %v34_v41  ;;  %v41_v44 = vld [vmem:[%s674_s0 + $0xb] sm:$0x1]  ;;  %v155_v46 = vsel %vm94_vm0, %v82_v39, 0.0  ;;  %v53_v48 = vld [vmem:[%s674_s0 + $0x17] sm:$0x1] }
   0xa   :  { %v125_v47 = vsel %vm94_vm0, %v72_v40, 0.0  ;;  %v43_v49 = vld [vmem:[%s674_s0 + $0xd] sm:$0x1]  ;;  %v31_v51 = vld [vmem:[%s674_s0 + $0x1] sm:$0x1]  ;;  %v85_v53 = vunpack.c.l.bf16 %v53_v48  ;;  %v73_v55 = vunpack.c.l.bf16 %v41_v44  ;;  %v398_v38 = vmov 0.0  }
   0xb   :  { %v489_v45 = vsel %vm94_vm0, %v66_v43, 0.0  ;;  %v185_v50 = vsel %vm94_vm0, %v92_v42, 0.0  ;;  %v30_v52 = vld [vmem:[%s674_s0] sm:$0x1]  ;;  %v75_v54 = vunpack.c.l.bf16 %v43_v49  ;;  %v63_v58 = vunpack.c.l.bf16 %v31_v51  ;;  %v35_v60 = vld [vmem:[%s674_s0 + $0x5] sm:$0x1] }
   0xc   :  { %v164_v56 = vsel %vm94_vm0, %v85_v53, 0.0  ;;  %v62_v59 = vunpack.c.l.bf16 %v30_v52  ;;  %v67_v61 = vunpack.c.l.bf16 %v35_v60  ;;  %v128_v62 = vsel %vm94_vm0, %v73_v55, 0.0  ;;  %v32_v2 = vld [vmem:[%s674_s0 + $0x2] sm:$0x1]  ;;  %v44_v3 = vld [vmem:[%s674_s0 + $0xe] sm:$0x1] }
   0xd   :  { %171 = vadd.xlane.f32.xlu0 %v170_v15  ;;  %144 = vadd.xlane.f32.xlu1 %v143_v16  ;;  %v134_v57 = vsel %vm94_vm0, %v75_v54, 0.0  ;;  %v98_v0 = vsel %vm94_vm0, %v63_v58, 0.0  ;;  %v61_v4 = vld [vmem:[%s674_s0 + $0x1f] sm:$0x1]  ;;  %v51_v5 = vld [vmem:[%s674_s0 + $0x15] sm:$0x1]  ;;  %v76_v6 = vunpack.c.l.bf16 %v44_v3  ;;  %v64_v10 = vunpack.c.l.bf16 %v32_v2 }
   0xe   :  { %177 = vadd.xlane.f32.xlu2 %v176_v17  ;;  %v110_v63 = vsel %vm94_vm0, %v67_v61, 0.0  ;;  %v95_v1 = vsel %vm94_vm0, %v62_v59, 0.0  ;;  %v45_v7 = vld [vmem:[%s674_s0 + $0xf] sm:$0x1]  ;;  %v93_v11 = vunpack.c.l.bf16 %v61_v4  ;;  %v83_v12 = vunpack.c.l.bf16 %v51_v5  ;;  %v36_v14 = vld [vmem:[%s674_s0 + $0x6] sm:$0x1] }
   0xf   :  { %v77_v8 = vunpack.c.l.bf16 %v45_v7  ;;  %v137_v9 = vsel %vm94_vm0, %v76_v6, 0.0  ;;  %v68_v15 = vunpack.c.l.bf16 %v36_v14  ;;  %v101_v17 = vsel %vm94_vm0, %v64_v10, 0.0  ;;  %v52_v20 = vld [vmem:[%s674_s0 + $0x16] sm:$0x1]  ;;  %v42_v21 = vld [vmem:[%s674_s0 + $0xc] sm:$0x1] }
  0x10   :  { %v188_v18 = vsel %vm94_vm0, %v93_v11, 0.0  ;;  %v158_v19 = vsel %vm94_vm0, %v83_v12, 0.0  ;;  %v37_v22 = vld [vmem:[%s674_s0 + $0x7] sm:$0x1]  ;;  %v33_v23 = vld [vmem:[%s674_s0 + $0x3] sm:$0x1] }
  0x11   :  { %v140_v13 = vsel %vm94_vm0, %v77_v8, 0.0  ;;  %v113_v16 = vsel %vm94_vm0, %v68_v15, 0.0  ;;  %v65_v28 = vunpack.c.l.bf16 %v33_v23  ;;  %25 = vst.msk [vmem:[#allocation2 + $0x18] sm:$0xff] %vm21_vm1, %v398_v38  ;;  %vm263_vm5 = vcmask 1044484  }
  0x12   :  { %22 = vst.msk [vmem:[#allocation2] sm:$0xff] %vm21_vm1, %v398_v38  ;;  %vm265_vm6 = vcmask 1045509   ;;  %vm267_vm7 = vcmask 1046534   ;;  %vm269_vm8 = vcmask 1047559   ;;  %vm318_vm9 = vcmask 261120  }
  0x13   :  { %v104_v31 = vsel %vm94_vm0, %v65_v28, 0.0  ;;  %23 = vst.msk [vmem:[#allocation2 + $0x8] sm:$0xff] %vm21_vm1, %v398_v38  ;;  %vm380_vm10 = vcmask 11264  }
  0x14   :  { %24 = vst.msk [vmem:[#allocation2 + $0x10] sm:$0xff] %vm21_vm1, %v398_v38  ;;  %v399_v38 = vmov 0  }
  0x15   :  { %150 = vadd.xlane.f32.xlu0 %v149_v24  ;;  %180 = vadd.xlane.f32.xlu1 %v179_v25  ;;  %v69_v24 = vunpack.c.l.bf16 %v37_v22  ;;  %v84_v25 = vunpack.c.l.bf16 %v52_v20 }
  0x16   :  { %120 = vadd.xlane.f32.xlu2 %v119_v26  ;;  %v74_v26 = vunpack.c.l.bf16 %v42_v21  ;;  %396 = vset.pattern.permute.xlu0 %v399_v38 }
  0x17   :  { %v116_v27 = vsel %vm94_vm0, %v69_v24, 0.0  ;;  %v161_v29 = vsel %vm94_vm0, %v84_v25, 0.0  ;;  %397 = vset.pattern.permute.xlu1 %v399_v38  ;;  %395 = vset.pattern.permute.xlu2 %v399_v38 }
  0x18   :  { %v131_v30 = vsel %vm94_vm0, %v74_v26, 0.0  ;;  %v29_v4 = vld [vmem:[#allocation2 + $0x18] sm:$0xff] }
  0x1d   :  { %153 = vadd.xlane.f32.xlu1 %v152_v33  ;;  %123 = vadd.xlane.f32.xlu0 %v122_v34 }
  0x1e   :  { %183 = vadd.xlane.f32.xlu2 %v182_v35 }
  0x25   :  { %156 = vadd.xlane.f32.xlu1 %v155_v46  ;;  %126 = vadd.xlane.f32.xlu0 %v125_v47 }
  0x26   :  { %186 = vadd.xlane.f32.xlu2 %v185_v50 }
  0x2d   :  { %99 = vadd.xlane.f32.xlu1 %v98_v0  ;;  %96 = vadd.xlane.f32.xlu0 %v95_v1 }
  0x2e   :  { %129 = vadd.xlane.f32.xlu2 %v128_v62 }
  0x35   :  { %189 = vadd.xlane.f32.xlu1 %v188_v18  ;;  %159 = vadd.xlane.f32.xlu0 %v158_v19 }
  0x36   :  { %102 = vadd.xlane.f32.xlu2 %v101_v17 }
  0x3d   :  { %162 = vadd.xlane.f32.xlu1 %v161_v29  ;;  %132 = vadd.xlane.f32.xlu0 %v131_v30  ;;  %v28_v29 = vld [vmem:[#allocation2 + $0x10] sm:$0xff] }
  0x3e   :  { %105 = vadd.xlane.f32.xlu2 %v104_v31 }
  0x45   :  { %165 = vadd.xlane.f32.xlu1 %v164_v56  ;;  %135 = vadd.xlane.f32.xlu0 %v134_v57 }
  0x46   :  { %108 = vadd.xlane.f32.xlu2 %v489_v45  ;;  %v223_v45 = vlaneseq }
  0x48   :  { %v566_v49 = vand.u32 127, %v223_v45 }
  0x4d   :  { %111 = vadd.xlane.f32.xlu1 %v110_v63  ;;  %138 = vadd.xlane.f32.xlu0 %v137_v9 }
  0x4e   :  { %141 = vadd.xlane.f32.xlu2 %v140_v13 }
  0x55   :  { %114 = vadd.xlane.f32.xlu0 %v113_v16  ;;  %117 = vadd.xlane.f32.xlu1 %v116_v27 }
  0x78   :  { %v175_v32 = vpop.xlane.xlu1 %174  ;;  %v169_v33 = vpop.xlane.xlu0 %168 }
  0x79   :  { %v148_v34 = vpop.xlane.xlu2 %147  ;;  %v249_v51 = vperm.slane %v169_v33, %v566_v49  ;;  %v251_v56 = vperm.slane %v175_v32, %v566_v49 }
  0x7a   :  { %v242_v11 = vperm.slane %v148_v34, %v566_v49  ;;  %v349_v34 = vld [vmem:[%s675_s2 + $0x8] sm:$0xff] }
  0x7b   :  { %357 = vperm.xlu0 %396, %v349_v34  }
  0x80   :  { %v172_v35 = vpop.xlane.xlu0 %171  ;;  %v145_v36 = vpop.xlane.xlu1 %144 }
  0x81   :  { %v178_v37 = vpop.xlane.xlu2 %177  ;;  %v250_v50 = vperm.slane %v172_v35, %v566_v49  ;;  %v241_v12 = vperm.slane %v145_v36, %v566_v49  ;;  %v362_v35 = vld [vmem:[%s676_s3] sm:$0xff] }
  0x82   :  { %v252_v57 = vperm.slane %v178_v37, %v566_v49  ;;  %366 = vperm.xlu1 %397, %v362_v35  }
  0x83   :  { %v285_v54 = vsel %vm257_vm2, %v250_v50, %v249_v51  ;;  %v278_v17 = vsel %vm257_vm2, %v242_v11, %v241_v12 }
  0x84   :  { %v286_v58 = vsel %vm259_vm3, %v251_v56, %v285_v54 }
  0x85   :  { %v287_v62 = vsel %vm261_vm4, %v252_v57, %v286_v58  ;;  %v27_v58 = vld [vmem:[#allocation2 + $0x8] sm:$0xff] }
  0x88   :  { %v151_v39 = vpop.xlane.xlu0 %150  ;;  %v181_v40 = vpop.xlane.xlu1 %180 }
  0x89   :  { %v560_v41 = vpop.xlane.xlu2 %120  ;;  %v253_v59 = vperm.slane %v181_v40, %v566_v49  ;;  %v243_v14 = vperm.slane %v151_v39, %v566_v49  ;;  %v348_v39 = vld [vmem:[%s675_s2] sm:$0xff] }
  0x8a   :  { %v233_v31 = vperm.slane %v560_v41, %v566_v49  ;;  %352 = vperm.xlu2 %395, %v348_v39  }
  0x8b   :  { %v288_v63 = vsel %vm263_vm5, %v253_v59, %v287_v62  ;;  %v279_v20 = vsel %vm259_vm3, %v243_v14, %v278_v17  ;;  %v363_v62 = vld [vmem:[%s676_s3 + $0x8] sm:$0xff] }
  0x90   :  { %v154_v42 = vpop.xlane.xlu1 %153  ;;  %v562_v43 = vpop.xlane.xlu0 %123 }
  0x91   :  { %v184_v44 = vpop.xlane.xlu2 %183  ;;  %v244_v15 = vperm.slane %v154_v42, %v566_v49  ;;  %v234_v32 = vperm.slane %v562_v43, %v566_v49 }
  0x92   :  { %v254_v60 = vperm.slane %v184_v44, %v566_v49  ;;  %371 = vperm.xlu2 %395, %v363_v62  }
  0x93   :  { %v280_v23 = vsel %vm261_vm4, %v244_v15, %v279_v20  ;;  %v271_v43 = vsel %vm257_vm2, %v234_v32, %v233_v31 }
  0x94   :  { %v289_v2 = vsel %vm265_vm6, %v254_v60, %v288_v63 }
  0x98   :  { %v157_v46 = vpop.xlane.xlu1 %156  ;;  %v564_v47 = vpop.xlane.xlu0 %126 }
  0x99   :  { %v187_v48 = vpop.xlane.xlu2 %186  ;;  %v245_v16 = vperm.slane %v157_v46, %v566_v49  ;;  %v235_v36 = vperm.slane %v564_v47, %v566_v49 }
  0x9a   :  { %v255_v61 = vperm.slane %v187_v48, %v566_v49 }
  0x9b   :  { %v281_v24 = vsel %vm263_vm5, %v245_v16, %v280_v23  ;;  %v272_v45 = vsel %vm259_vm3, %v235_v36, %v271_v43 }
  0x9c   :  { %v290_v6 = vsel %vm267_vm7, %v255_v61, %v289_v2 }
  0xa0   :  { %v570_v52 = vpop.xlane.xlu1 %99  ;;  %v572_v53 = vpop.xlane.xlu0 %96 }
  0xa1   :  { %v575_v55 = vpop.xlane.xlu2 %129  ;;  %v225_v56 = vperm.slane %v572_v53, %v566_v49 }
  0xa2   :  { %v236_v40 = vperm.slane %v575_v55, %v566_v49  ;;  %v226_v55 = vperm.slane %v570_v52, %v566_v49 }
  0xa4   :  { %v273_v46 = vsel %vm261_vm4, %v236_v40, %v272_v45  ;;  %v258_v2 = vsel %vm257_vm2, %v226_v55, %v225_v56 }
  0xa8   :  { %v190_v0 = vpop.xlane.xlu1 %189  ;;  %v160_v1 = vpop.xlane.xlu0 %159 }
  0xa9   :  { %v586_v3 = vpop.xlane.xlu2 %102  ;;  %v256_v5 = vperm.slane %v190_v0, %v566_v49  ;;  %v246_v18 = vperm.slane %v160_v1, %v566_v49 }
  0xaa   :  { %v227_v60 = vperm.slane %v586_v3, %v566_v49 }
  0xab   :  { %v291_v7 = vsel %vm269_vm8, %v256_v5, %v290_v6  ;;  %v282_v27 = vsel %vm265_vm6, %v246_v18, %v281_v24 }
  0xac   :  { %v299_v8 = vadd.f32 %v291_v7, %v29_v4  ;;  %v260_v5 = vsel %vm259_vm3, %v227_v60, %v258_v2 }
  0xae   :  { %304 = vst.msk [vmem:[#allocation2 + $0x18] sm:$0xff] %vm21_vm1, %v299_v8 }
  0xb0   :  { %v163_v9 = vpop.xlane.xlu1 %162  ;;  %v133_v10 = vpop.xlane.xlu0 %132 }
  0xb1   :  { %v594_v13 = vpop.xlane.xlu2 %105  ;;  %v247_v21 = vperm.slane %v163_v9, %v566_v49  ;;  %v237_v42 = vperm.slane %v133_v10, %v566_v49 }
  0xb2   :  { %v228_v52 = vperm.slane %v594_v13, %v566_v49  ;;  %v26_v13 = vld [vmem:[#allocation2] sm:$0xff] }
  0xb3   :  { %v283_v33 = vsel %vm267_vm7, %v247_v21, %v282_v27  ;;  %v274_v50 = vsel %vm263_vm5, %v237_v42, %v273_v46  ;;  %v317_v21 = vld [vmem:[%s677_s1 + $0x8] sm:$0xff] }
  0xb4   :  { %v262_v6 = vsel %vm261_vm4, %v228_v52, %v260_v5 }
  0xb5   :  { %v311_v19 = vld [vmem:[#allocation2 + $0x18] sm:$0xff] }
  0xb6   :  { %v315_v22 = vmul.f32 0.0625, %v311_v19 }
  0xb8   :  { %337 = vmatpush.msra.mxu0 %v315_v22  ;;  %389 = vmatpush.msra.mxu1 %v315_v22  ;;  %v166_v25 = vpop.xlane.xlu1 %165  ;;  %v136_v26 = vpop.xlane.xlu0 %135 }
  0xb9   :  { %v109_v28 = vpop.xlane.xlu2 %108  ;;  %v248_v30 = vperm.slane %v166_v25, %v566_v49  ;;  %v238_v44 = vperm.slane %v136_v26, %v566_v49 }
  0xba   :  { %v229_v53 = vperm.slane %v109_v28, %v566_v49 }
  0xbb   :  { %v284_v37 = vsel %vm269_vm8, %v248_v30, %v283_v33  ;;  %v275_v57 = vsel %vm265_vm6, %v238_v44, %v274_v50 }
  0xbc   :  { %v298_v41 = vadd.f32 %v284_v37, %v28_v29  ;;  %v264_v9 = vsel %vm263_vm5, %v229_v53, %v262_v6 }
  0xbe   :  { %303 = vst.msk [vmem:[#allocation2 + $0x10] sm:$0xff] %vm21_vm1, %v298_v41 }
  0xc0   :  { %v112_v47 = vpop.xlane.xlu1 %111  ;;  %v139_v48 = vpop.xlane.xlu0 %138 }
  0xc1   :  { %v239_v51 = vperm.slane %v139_v48, %v566_v49  ;;  %v142_v54 = vpop.xlane.xlu2 %141  ;;  %v230_v4 = vperm.slane %v112_v47, %v566_v49 }
  0xc2   :  { %v240_v59 = vperm.slane %v142_v54, %v566_v49 }
  0xc3   :  { %v276_v61 = vsel %vm267_vm7, %v239_v51, %v275_v57  ;;  %v266_v12 = vsel %vm265_vm6, %v230_v4, %v264_v9 }
  0xc4   :  { %v277_v63 = vsel %vm269_vm8, %v240_v59, %v276_v61 }
  0xc5   :  { %v297_v0 = vadd.f32 %v277_v63, %v27_v58  ;;  %v310_v1 = vld [vmem:[#allocation2 + $0x10] sm:$0xff] }
  0xc6   :  { %v314_v3 = vmul.f32 0.0625, %v310_v1 }
  0xc7   :  { %302 = vst.msk [vmem:[#allocation2 + $0x8] sm:$0xff] %vm21_vm1, %v297_v0 }
  0xc8   :  { %338 = vmatpush.msra.mxu0 %v314_v3  ;;  %390 = vmatpush.msra.mxu1 %v314_v3  ;;  %v115_v7 = vpop.xlane.xlu0 %114  ;;  %v118_v8 = vpop.xlane.xlu1 %117 }
  0xc9   :  { %v231_v10 = vperm.slane %v115_v7, %v566_v49  ;;  %v232_v11 = vperm.slane %v118_v8, %v566_v49  ;;  %v316_v49 = vld [vmem:[%s677_s1] sm:$0xff] }
  0xcb   :  { %v268_v14 = vsel %vm267_vm7, %v231_v10, %v266_v12 }
  0xcc   :  { %v270_v15 = vsel %vm269_vm8, %v232_v11, %v268_v14 }
  0xcd   :  { %v296_v16 = vadd.f32 %v270_v15, %v26_v13 }
  0xce   :  { %v309_v17 = vld [vmem:[#allocation2 + $0x8] sm:$0xff] }
  0xcf   :  { %301 = vst.msk [vmem:[#allocation2] sm:$0xff] %vm21_vm1, %v296_v16  ;;  %v313_v18 = vmul.f32 0.0625, %v309_v17 }
  0xd1   :  { %339 = vmatpush.msra.mxu0 %v313_v18  ;;  %391 = vmatpush.msra.mxu1 %v313_v18 }
  0xd6   :  { %v308_v19 = vld [vmem:[#allocation2] sm:$0xff] }
  0xd7   :  { %v312_v20 = vmul.f32 0.0625, %v308_v19 }
  0xd9   :  { %340 = vmatpush.msra.mxu0 %v312_v20  ;;  %392 = vmatpush.msra.mxu1 %v312_v20 }
  0xda   :  { %387 = vmatmul.msk.f32.vlgmr.msra.gmra.mxu0 %vm318_vm9, %v316_v49  ;;  %388 = vmatmul.msk.f32.vlgmr.msra.gmra.mxu1 %vm318_vm9, %v317_v21 }
  0xe4   :  { %v353_v22 = vpop.permute.xlu2 %352 }
  0xec   :  { %v372_v29 = vpop.permute.xlu2 %371 }
  0xed   :  { %v358_v23 = vpop.permute.xlu0 %357 }
  0xf4   :  { %v367_v24 = vpop.permute.xlu1 %366 }
 0x157   :  { %v342_v25 = vpop.f32.mrf.mxu0  ;;  %v345_v26 = vpop.f32.mrf.mxu1 }
 0x158   :  { %v360_v27 = vmul.f32 %v353_v22, %v342_v25  ;;  %v361_v28 = vmul.f32 %v358_v23, %v345_v26 }
 0x15a   :  { %v375_v30 = vadd.f32 %v372_v29, %v361_v28  ;;  %v374_v31 = vadd.f32 %v367_v24, %v360_v27 }
 0x15c   :  { %v377_v32 = vmax.f32 %v375_v30, 0.0  ;;  %v376_v33 = vmax.f32 %v374_v31, 0.0 }
 0x15e   :  { %v379_v34 = vpack.c.bf16 %v377_v32, %v377_v32  ;;  %v378_v35 = vpack.c.bf16 %v376_v33, %v376_v33 }
 0x160   :  { %382 = vst.msk [vmem:[%s678_s4 + $0x4] sm:$0xf] %vm380_vm10, %v379_v34 }
 0x161   :  { %381 = vst.msk [vmem:[%s678_s4] sm:$0xf] %vm380_vm10, %v378_v35 }

// kernel: deeplab_forward.23
= control target key start
LH: loop header
LB: loop body
LE: loop exit
PB: predicated region body
PF: predicated region fallthrough
CT: control target
= control target key end

     0   :  { %vm53_vm0 = vcmask 130048   ;;  %vm208_vm1 = vcmask 1040384   ;;  %v338_v14 = vmov 0   ;;  %vm204_vm2 = vcmask 15360   ;;  %s437_s1 = inlined_call_operand.vmem [shape: bf16[16,128], index: 1, kind: input, shape index: {}]   ;;  %s438_s0 = inlined_call_operand.vmem [shape: bf16[16,128], index: 0, kind: input, shape index: {}]   ;;  %s439_s2 = inlined_call_operand.vmem [shape: bf16[16,128], index: 2, kind: input, shape index: {}]   ;;  %s440_s3 = inlined_call_operand.vmem [shape: bf16[16,128], index: 3, kind: input, shape index: {}]   ;;  %s441_s4 = inlined_call_operand.vmem [shape: bf16[5,16,16], index: 4, kind: input, shape index: {}]   ;;  %s442_s5 = inlined_call_operand.vmem [shape: bf16[16,2], index: 5, kind: input, shape index: {}]   ;;  %s443_s6 = inlined_call_operand.vmem [shape: bf16[2,128], index: 6, kind: input, shape index: {}]   ;;  %s444_s7 = inlined_call_operand.vmem [shape: f32[16,1], index: 7, kind: input, shape index: {}]   ;;  %s445_s8 = inlined_call_operand.vmem [shape: f32[16,1], index: 8, kind: input, shape index: {}]   ;;  %s446_s9 = inlined_call_operand.vmem [shape: bf16[16,128], index: 9, kind: output, shape index: {}]  }
   0x1   :  { %v323_v0 = vld [vmem:[%s437_s1] sm:$0xff]  ;;  %v322_v4 = vld [vmem:[%s441_s4 + $0x8] sm:$0xff]  ;;  %v324_v6 = vld [vmem:[%s441_s4 + $0x10] sm:$0xff]  ;;  %336 = vset.pattern.permute.xlu0 %v338_v14  ;;  %337 = vset.pattern.permute.xlu1 %v338_v14 }
   0x2   :  { %v321_v1 = vld [vmem:[%s438_s0] sm:$0xff]  ;;  %64 = vmatpush.bf16.msra.mxu0 %v323_v0  ;;  %v326_v8 = vld [vmem:[%s441_s4 + $0x18] sm:$0xff]  ;;  %v229_v16 = vld [vmem:[%s444_s7 + $0x8] sm:$0xff] }
   0x3   :  { %v325_v2 = vld [vmem:[%s439_s2] sm:$0xff]  ;;  %92 = vmatpush.bf16.msra.mxu1 %v321_v1  ;;  %v243_v17 = vld [vmem:[%s445_s8 + $0x8] sm:$0xff] }
   0x4   :  { %v327_v3 = vld [vmem:[%s440_s3] sm:$0xff]  ;;  %125 = vmatpush.bf16.msra.mxu2 %v325_v2 }
   0x5   :  { %v320_v5 = vld [vmem:[%s441_s4] sm:$0xff]  ;;  %160 = vmatpush.bf16.msra.mxu3 %v327_v3  ;;  %276 = vmatmul.msk.bf16.vlgmr.msra.gmra.mxu0 %vm53_vm0, %v322_v4 }
   0x6   :  { %v329_v7 = vld [vmem:[%s442_s5] sm:$0xff]  ;;  %285 = vmatmul.msk.bf16.vlgmr.msra.gmra.mxu1 %vm53_vm0, %v320_v5 }
   0x7   :  { %195 = vmatpush.bf16.msrb.mxu0 %v329_v7  ;;  %296 = vmatmul.msk.bf16.vlgmr.msra.gmra.mxu2 %vm53_vm0, %v324_v6  ;;  %v328_v9 = vld [vmem:[%s441_s4 + $0x20] sm:$0xff] }
   0x8   :  { %307 = vmatmul.msk.bf16.vlgmr.msra.gmra.mxu3 %vm53_vm0, %v326_v8  ;;  %v203_v10 = vld [vmem:[%s443_s6] sm:$0x1] }
   0x9   :  { %v210_v11 = vsel %vm208_vm1, %v203_v10, 0  ;;  %v228_v12 = vld [vmem:[%s444_s7] sm:$0xff] }
   0xa   :  { %219 = vmatpush.bf16.msrb.mxu1 %v210_v11  ;;  %v242_v13 = vld [vmem:[%s445_s8] sm:$0xff]  ;;  %232 = vperm.xlu0 %336, %v228_v12  }
   0xb   :  { %246 = vperm.xlu1 %337, %v242_v13  }
  0x12   :  { %237 = vperm.xlu0 %336, %v229_v16  }
  0x13   :  { %251 = vperm.xlu1 %337, %v243_v17  }
  0x15   :  { %318 = vmatmul.msk.bf16.vlgmr.msrb.gmra.mxu0 %vm53_vm0, %v328_v9 }
  0x7c   :  { %v233_v29 = vpop.permute.xlu0 %232 }
  0x7d   :  { %v247_v33 = vpop.permute.xlu1 %246 }
  0x82   :  { %v66_v15 = vpop.f32.mrf.mxu0 }
  0x83   :  { %v94_v22 = vpop.f32.mrf.mxu1 }
  0x84   :  { %v95_v26 = vadd.f32 %v94_v22, %v66_v15  ;;  %v238_v41 = vpop.permute.xlu0 %237 }
  0x85   :  { %v252_v44 = vpop.permute.xlu1 %251 }
  0x8a   :  { %v68_v18 = vpop.f32.mrf.mxu0  ;;  %v127_v23 = vpop.f32.mrf.mxu2 }
  0x8b   :  { %v96_v24 = vpop.f32.mrf.mxu1  ;;  %v162_v25 = vpop.f32.mrf.mxu3  ;;  %v132_v27 = vadd.f32 %v127_v23, %v95_v26 }
  0x8c   :  { %v97_v31 = vadd.f32 %v96_v24, %v68_v18 }
  0x8d   :  { %v167_v32 = vadd.f32 %v162_v25, %v132_v27 }
  0x92   :  { %v197_v19 = vpop.f32.mrf.mxu0  ;;  %v129_v28 = vpop.f32.mrf.mxu2 }
  0x93   :  { %v133_v34 = vadd.f32 %v129_v28, %v97_v31  ;;  %v164_v36 = vpop.f32.mrf.mxu3 }
  0x95   :  { %v168_v37 = vadd.f32 %v164_v36, %v133_v34 }
  0x9a   :  { %v199_v20 = vpop.f32.mrf.mxu0 }
  0x9b   :  { %v202_v21 = vpack.c.bf16 %v199_v20, %v197_v19 }
  0x9d   :  { %319 = vmatmul.msk.bf16.vlgmr.msrb.gmra.mxu1 %vm204_vm2, %v202_v21 }
 0x11a   :  { %v221_v30 = vpop.f32.mrf.mxu1 }
 0x11b   :  { %v226_v35 = vadd.f32 %v221_v30, %v167_v32 }
 0x11d   :  { %v240_v38 = vmul.f32 %v233_v29, %v226_v35 }
 0x11f   :  { %v254_v42 = vadd.f32 %v247_v33, %v240_v38 }
 0x121   :  { %v256_v46 = vmax.f32 %v254_v42, 0.0 }
 0x122   :  { %v223_v39 = vpop.f32.mrf.mxu1 }
 0x123   :  { %v227_v40 = vadd.f32 %v223_v39, %v168_v37 }
 0x125   :  { %v241_v43 = vmul.f32 %v238_v41, %v227_v40 }
 0x127   :  { %v255_v45 = vadd.f32 %v252_v44, %v241_v43 }
 0x129   :  { %v257_v47 = vmax.f32 %v255_v45, 0.0 }
 0x12b   :  { %v333_v48 = vpack.c.bf16 %v257_v47, %v256_v46 }
 0x12d   :  { %334 = vst [vmem:[%s446_s9] sm:$0xff] %v333_v48  }

// kernel: deeplab_forward.25
= control target key start
LH: loop header
LB: loop body
LE: loop exit
PB: predicated region body
PF: predicated region fallthrough
CT: control target
= control target key end

     0   :  { %s295_s9 = smov 0   ;;  %s309_s0 = inlined_call_operand.vmem [shape: bf16[16,64], index: 0, kind: input, shape index: {}]   ;;  %s310_s1 = inlined_call_operand.vmem [shape: bf16[32,16], index: 1, kind: input, shape index: {}]   ;;  %s311_s2 = inlined_call_operand.vmem [shape: bf16[32,64], index: 2, kind: output, shape index: {}]  }
   0x1 LB: > { %s242_s10 = sadd.s32 4294967295, %s278_s9   ;;  %p246_p0 = scmp.ge.s32.totalorder %s278_s9, 1  ;;  %s278_s9 = sphi %s295_s9, %s12_s9  }
   0x2   : > { %p113_p1 = scmp.lt.s32.totalorder %s278_s9, 3 }
   0x4   : > { %p114_p2 = pnand %p246_p0, %p113_p1 }
   0x5   : > { %s247_s13 = sshll.u32 (!%p114_p2), %s242_s10, 1 }
   0x6   : > { %117 = sbr.rel (%p114_p2) target bundleno = 152 (0x98), region = 28  ;;  %p136_p3 = scmp.lt.s32.totalorder (!%p114_p2), %s247_s13, 3 }
   0xb   : > { %v263_v0 = vld [vmem:[%s309_s0] sm:$0xff]  ;;  %s313_s13 = smov (!%p136_p3, %s247_s13), 3  ;;  %vm163_vm0 = vcmask 130048   ;;  %vm183_vm1 = vcmask 519168  }
   0xc   : > { %174 = vmatpush.bf16.msra.mxu0 %v263_v0  ;;  %s248_s14 = sshll.u32 %s313_s13, 2 }
   0xd   : > { %s139_s17 = scalar_lea.vmem %s310_s1, %s248_s14  ;;  %s145_s20 = scalar_lea.vmem %s311_s2, %s248_s14 }
   0xe   : > { %v262_v1 = vld [vmem:[%s139_s17] sm:$0xff] }
   0xf   : > { %259 = vmatmul.msk.bf16.vlgmr.msra.gmra.mxu0 %vm163_vm0, %v262_v1 }
  0x8c   : > { %v176_v2 = vpop.f32.mrf.mxu0 }
  0x8d   : > { %v181_v3 = vpack.c.bf16 %v176_v2, %v176_v2 }
  0x8f   : > { %184 = vst.msk [vmem:[%s145_s20] sm:$0xf] %vm183_vm1, %v181_v3 }
  0x94   : > { %v178_v4 = vpop.f32.mrf.mxu0 }
  0x95   : > { %v182_v5 = vpack.c.bf16 %v178_v4, %v178_v4 }
  0x97   : > { %185 = vst.msk [vmem:[%s145_s20 + $0x4] sm:$0xf] %vm183_vm1, %v182_v5 }
  0x98 PF: > { %s12_s9 = sadd.s32 1, %s278_s9  }
  0x99   : > { %p9_p4 = scmp.ge.s32.totalorder %s12_s9, 4  }
  0x9b   :  { %11 = sbr.rel (!%p9_p4) target bundleno = 1 (0x1), region = 58 }

// kernel: deeplab_forward.24
= control target key start
LH: loop header
LB: loop body
LE: loop exit
PB: predicated region body
PF: predicated region fallthrough
CT: control target
= control target key end

     0   :  { %v73_v0 = vmov 0   ;;  %vm27_vm0 = vcmask 130048   ;;  %s114_s2 = inlined_call_operand.vmem [shape: f32[8,1], index: 2, kind: input, shape index: {}]   ;;  %s115_s1 = inlined_call_operand.vmem [shape: bf16[16,128], index: 1, kind: input, shape index: {}]   ;;  %s116_s0 = inlined_call_operand.vmem [shape: bf16[8,16], index: 0, kind: input, shape index: {}]   ;;  %s117_s3 = inlined_call_operand.vmem [shape: f32[8,1], index: 3, kind: input, shape index: {}]   ;;  %s118_s4 = inlined_call_operand.vmem [shape: bf16[8,128], index: 4, kind: output, shape index: {}]  }
   0x1   :  { %72 = vset.pattern.permute.xlu0 %v73_v0  ;;  %v44_v1 = vld [vmem:[%s114_s2] sm:$0xff] }
   0x2   :  { %v70_v2 = vld [vmem:[%s115_s1] sm:$0xff]  ;;  %47 = vperm.xlu0 %72, %v44_v1  }
   0x3   :  { %38 = vmatpush.bf16.msra.mxu0 %v70_v2  ;;  %v18_v3 = vld [vmem:[%s116_s0] sm:$0xf] }
   0x4   :  { %v51_v4 = vld [vmem:[%s117_s3] sm:$0xff] }
   0x6   :  { %69 = vmatmul.msk.bf16.vlgmr.msra.gmra.mxu0 %vm27_vm0, %v18_v3 }
   0xa   :  { %54 = vperm.xlu0 %72, %v51_v4  }
  0x74   :  { %v48_v5 = vpop.permute.xlu0 %47 }
  0x7c   :  { %v55_v8 = vpop.permute.xlu0 %54 }
  0x83   :  { %v40_v6 = vpop.f32.mrf.mxu0 }
  0x84   :  { %v50_v7 = vmul.f32 %v48_v5, %v40_v6 }
  0x86   :  { %v57_v9 = vadd.f32 %v55_v8, %v50_v7 }
  0x88   :  { %v58_v10 = vmax.f32 %v57_v9, 0.0 }
  0x8a   :  { %v59_v11 = vpack.c.bf16 %v58_v10, %v58_v10 }
  0x8b   :  { %v42_v12 = vpop.f32.mrf.mxu0 }
  0x8c   :  { %60 = vst [vmem:[%s118_s4] sm:$0xf] %v59_v11 }

// kernel: deeplab_forward.26
= control target key start
LH: loop header
LB: loop body
LE: loop exit
PB: predicated region body
PF: predicated region fallthrough
CT: control target
= control target key end

     0   :  { %v300_v4 = vmov 0   ;;  %vm141_vm0 = vcmask 785408   ;;  %s395_s1 = inlined_call_operand.vmem [shape: bf16[224,128], index: 1, kind: input, shape index: {}]   ;;  %s396_s2 = inlined_call_operand.vmem [shape: f32[16,1], index: 2, kind: input, shape index: {}]   ;;  %s397_s3 = inlined_call_operand.vmem [shape: f32[16,1], index: 3, kind: input, shape index: {}]   ;;  %s398_s0 = inlined_call_operand.vmem [shape: bf16[16,224], index: 0, kind: input, shape index: {}]   ;;  %s399_s4 = inlined_call_operand.vmem [shape: bf16[16,128], index: 4, kind: output, shape index: {}]  }
   0x1   :  { %v285_v0 = vld [vmem:[%s395_s1 + $0x38] sm:$0xff]  ;;  %v291_v1 = vld [vmem:[%s395_s1 + $0x68] sm:$0xff]  ;;  %v284_v2 = vld [vmem:[%s395_s1 + $0x30] sm:$0xff]  ;;  %298 = vset.pattern.permute.xlu0 %v300_v4  ;;  %299 = vset.pattern.permute.xlu1 %v300_v4 }
   0x2   :  { %145 = vmatpush.bf16.msra.mxu0 %v285_v0  ;;  %161 = vmatpush.bf16.msra.mxu1 %v291_v1  ;;  %v290_v3 = vld [vmem:[%s395_s1 + $0x60] sm:$0xff]  ;;  %v283_v5 = vld [vmem:[%s395_s1 + $0x28] sm:$0xff]  ;;  %v289_v6 = vld [vmem:[%s395_s1 + $0x58] sm:$0xff] }
   0x3   :  { %v173_v7 = vld [vmem:[%s396_s2] sm:$0xff]  ;;  %v288_v10 = vld [vmem:[%s395_s1 + $0x50] sm:$0xff]  ;;  %v174_v11 = vld [vmem:[%s396_s2 + $0x8] sm:$0xff] }
   0x4   :  { %v187_v8 = vld [vmem:[%s397_s3] sm:$0xff]  ;;  %177 = vperm.xlu0 %298, %v173_v7   ;;  %v188_v12 = vld [vmem:[%s397_s3 + $0x8] sm:$0xff]  ;;  %v281_v13 = vld [vmem:[%s395_s1 + $0x18] sm:$0xff] }
   0x5   :  { %191 = vperm.xlu1 %299, %v187_v8   ;;  %v282_v9 = vld [vmem:[%s395_s1 + $0x20] sm:$0xff]  ;;  %v287_v14 = vld [vmem:[%s395_s1 + $0x48] sm:$0xff]  ;;  %v280_v15 = vld [vmem:[%s395_s1 + $0x10] sm:$0xff] }
   0x6   :  { %146 = vmatpush.bf16.msra.mxu0 %v284_v2  ;;  %162 = vmatpush.bf16.msra.mxu1 %v290_v3  ;;  %v286_v16 = vld [vmem:[%s395_s1 + $0x40] sm:$0xff]  ;;  %v215_v18 = vld [vmem:[%s398_s0 + $0x8] sm:$0xf0]  ;;  %v277_v23 = vld [vmem:[%s398_s0 + $0x4] sm:$0xf0] }
   0x7   :  { %v276_v17 = vld [vmem:[%s398_s0 + $0x4] sm:$0xf]  ;;  %v279_v20 = vld [vmem:[%s395_s1 + $0x8] sm:$0xff]  ;;  %v213_v22 = vld [vmem:[%s398_s0] sm:$0xf] }
   0x8   :  { %v218_v19 = vor.u32 %v276_v17, %v215_v18  ;;  %v278_v21 = vld [vmem:[%s395_s1] sm:$0xff]  ;;  %v214_v24 = vor.u32 %v277_v23, %v213_v22 }
   0xa   :  { %147 = vmatpush.bf16.msra.mxu0 %v283_v5  ;;  %163 = vmatpush.bf16.msra.mxu1 %v289_v6 }
   0xc   :  { %182 = vperm.xlu0 %298, %v174_v11  }
   0xd   :  { %196 = vperm.xlu1 %299, %v188_v12  }
   0xe   :  { %148 = vmatpush.bf16.msra.mxu0 %v282_v9  ;;  %164 = vmatpush.bf16.msra.mxu1 %v288_v10 }
  0x12   :  { %149 = vmatpush.bf16.msra.mxu0 %v281_v13  ;;  %165 = vmatpush.bf16.msra.mxu1 %v287_v14 }
  0x16   :  { %150 = vmatpush.bf16.msra.mxu0 %v280_v15  ;;  %166 = vmatpush.bf16.msra.mxu1 %v286_v16 }
  0x19   :  { %275 = vmatmul.msk.bf16.vlgmr.msra.gmra.mxu1 %vm141_vm0, %v218_v19 }
  0x1a   :  { %151 = vmatpush.bf16.msra.mxu0 %v279_v20 }
  0x1e   :  { %152 = vmatpush.bf16.msra.mxu0 %v278_v21 }
  0x21   :  { %153 = vmatmul.bf16.vlgmr.msra.gmra.mxu0 %v214_v24 }
  0x76   :  { %v178_v26 = vpop.permute.xlu0 %177 }
  0x77   :  { %v192_v28 = vpop.permute.xlu1 %191 }
  0x7e   :  { %v183_v34 = vpop.permute.xlu0 %182 }
  0x7f   :  { %v197_v37 = vpop.permute.xlu1 %196 }
  0x96   :  { %v168_v25 = vpop.f32.mrf.mxu1 }
  0x9e   :  { %v154_v27 = vpop.f32.mrf.mxu0  ;;  %v170_v31 = vpop.f32.mrf.mxu1 }
  0x9f   :  { %v169_v29 = vadd.f32 %v168_v25, %v154_v27 }
  0xa1   :  { %v185_v30 = vmul.f32 %v178_v26, %v169_v29 }
  0xa3   :  { %v199_v35 = vadd.f32 %v192_v28, %v185_v30 }
  0xa5   :  { %v201_v39 = vmax.f32 %v199_v35, 0.0 }
  0xa6   :  { %v156_v32 = vpop.f32.mrf.mxu0 }
  0xa7   :  { %v171_v33 = vadd.f32 %v170_v31, %v156_v32 }
  0xa9   :  { %v186_v36 = vmul.f32 %v183_v34, %v171_v33 }
  0xab   :  { %v200_v38 = vadd.f32 %v197_v37, %v186_v36 }
  0xad   :  { %v202_v40 = vmax.f32 %v200_v38, 0.0 }
  0xaf   :  { %v295_v41 = vpack.c.bf16 %v202_v40, %v201_v39 }
  0xb1   :  { %296 = vst [vmem:[%s399_s4] sm:$0xff] %v295_v41  }

// kernel: deeplab_forward.27
= control target key start
LH: loop header
LB: loop body
LE: loop exit
PB: predicated region body
PF: predicated region fallthrough
CT: control target
= control target key end

     0   :  { %v235_v5 = vmov 0   ;;  %vm101_vm0 = vcmask 130048   ;;  %s315_s1 = inlined_call_operand.vmem [shape: bf16[144,128], index: 1, kind: input, shape index: {}]   ;;  %s316_s0 = inlined_call_operand.vmem [shape: bf16[16,144], index: 0, kind: input, shape index: {}]   ;;  %s317_s2 = inlined_call_operand.vmem [shape: f32[16,1], index: 2, kind: input, shape index: {}]   ;;  %s318_s3 = inlined_call_operand.vmem [shape: f32[16,1], index: 3, kind: input, shape index: {}]   ;;  %s319_s4 = inlined_call_operand.vmem [shape: bf16[16,128], index: 4, kind: output, shape index: {}]  }
   0x1   :  { %v225_v0 = vld [vmem:[%s315_s1 + $0x38] sm:$0xff]  ;;  %v224_v1 = vld [vmem:[%s315_s1 + $0x30] sm:$0xff]  ;;  %v226_v2 = vld [vmem:[%s315_s1 + $0x40] sm:$0xff]  ;;  %233 = vset.pattern.permute.xlu0 %v235_v5  ;;  %234 = vset.pattern.permute.xlu1 %v235_v5 }
   0x2   :  { %105 = vmatpush.bf16.msra.mxu0 %v225_v0  ;;  %v216_v3 = vld [vmem:[%s316_s0 + $0x4] sm:$0xf]  ;;  %v175_v4 = vld [vmem:[%s316_s0 + $0x8] sm:$0xf0]  ;;  %126 = vmatpush.bf16.msra.mxu1 %v226_v2  ;;  %v221_v13 = vld [vmem:[%s315_s1 + $0x18] sm:$0xff] }
   0x3   :  { %v178_v6 = vor.u32 %v216_v3, %v175_v4  ;;  %v133_v7 = vld [vmem:[%s317_s2] sm:$0xff]  ;;  %v223_v9 = vld [vmem:[%s315_s1 + $0x28] sm:$0xff]  ;;  %v220_v14 = vld [vmem:[%s315_s1 + $0x10] sm:$0xff] }
   0x4   :  { %v147_v8 = vld [vmem:[%s318_s3] sm:$0xff]  ;;  %137 = vperm.xlu0 %233, %v133_v7   ;;  %v134_v11 = vld [vmem:[%s317_s2 + $0x8] sm:$0xff] }
   0x5   :  { %151 = vperm.xlu1 %234, %v147_v8   ;;  %215 = vmatmul.msk.bf16.vlgmr.msra.gmra.mxu1 %vm101_vm0, %v178_v6  ;;  %v222_v10 = vld [vmem:[%s315_s1 + $0x20] sm:$0xff]  ;;  %v148_v12 = vld [vmem:[%s318_s3 + $0x8] sm:$0xff] }
   0x6   :  { %106 = vmatpush.bf16.msra.mxu0 %v224_v1  ;;  %v219_v15 = vld [vmem:[%s315_s1 + $0x8] sm:$0xff]  ;;  %v218_v16 = vld [vmem:[%s315_s1] sm:$0xff] }
   0x7   :  { %v173_v17 = vld [vmem:[%s316_s0] sm:$0xf]  ;;  %v217_v18 = vld [vmem:[%s316_s0 + $0x4] sm:$0xf0] }
   0x8   :  { %v174_v19 = vor.u32 %v217_v18, %v173_v17 }
   0xa   :  { %107 = vmatpush.bf16.msra.mxu0 %v223_v9 }
   0xc   :  { %142 = vperm.xlu0 %233, %v134_v11  }
   0xd   :  { %156 = vperm.xlu1 %234, %v148_v12  }
   0xe   :  { %108 = vmatpush.bf16.msra.mxu0 %v222_v10 }
  0x12   :  { %109 = vmatpush.bf16.msra.mxu0 %v221_v13 }
  0x16   :  { %110 = vmatpush.bf16.msra.mxu0 %v220_v14 }
  0x1a   :  { %111 = vmatpush.bf16.msra.mxu0 %v219_v15 }
  0x1e   :  { %112 = vmatpush.bf16.msra.mxu0 %v218_v16 }
  0x21   :  { %113 = vmatmul.bf16.vlgmr.msra.gmra.mxu0 %v174_v19 }
  0x76   :  { %v138_v21 = vpop.permute.xlu0 %137 }
  0x77   :  { %v152_v23 = vpop.permute.xlu1 %151 }
  0x7e   :  { %v143_v29 = vpop.permute.xlu0 %142 }
  0x7f   :  { %v157_v32 = vpop.permute.xlu1 %156 }
  0x82   :  { %v128_v20 = vpop.f32.mrf.mxu1 }
  0x8a   :  { %v130_v26 = vpop.f32.mrf.mxu1 }
  0x9e   :  { %v114_v22 = vpop.f32.mrf.mxu0 }
  0x9f   :  { %v129_v24 = vadd.f32 %v128_v20, %v114_v22 }
  0xa1   :  { %v145_v25 = vmul.f32 %v138_v21, %v129_v24 }
  0xa3   :  { %v159_v30 = vadd.f32 %v152_v23, %v145_v25 }
  0xa5   :  { %v161_v34 = vmax.f32 %v159_v30, 0.0 }
  0xa6   :  { %v116_v27 = vpop.f32.mrf.mxu0 }
  0xa7   :  { %v131_v28 = vadd.f32 %v130_v26, %v116_v27 }
  0xa9   :  { %v146_v31 = vmul.f32 %v143_v29, %v131_v28 }
  0xab   :  { %v160_v33 = vadd.f32 %v157_v32, %v146_v31 }
  0xad   :  { %v162_v35 = vmax.f32 %v160_v33, 0.0 }
  0xaf   :  { %v230_v36 = vpack.c.bf16 %v162_v35, %v161_v34 }
  0xb1   :  { %231 = vst [vmem:[%s319_s4] sm:$0xff] %v230_v36  }

// kernel: deeplab_forward.28
= control target key start
LH: loop header
LB: loop body
LE: loop exit
PB: predicated region body
PF: predicated region fallthrough
CT: control target
= control target key end

     0   :  { %v71_v1 = vmov 0   ;;  %vm27_vm0 = vcmask 130048   ;;  %s112_s1 = inlined_call_operand.vmem [shape: bf16[16,128], index: 1, kind: input, shape index: {}]   ;;  %s113_s2 = inlined_call_operand.vmem [shape: f32[5,1], index: 2, kind: input, shape index: {}]   ;;  %s114_s0 = inlined_call_operand.vmem [shape: bf16[5,16], index: 0, kind: input, shape index: {}]   ;;  %s115_s3 = inlined_call_operand.vmem [shape: f32[5,1], index: 3, kind: input, shape index: {}]   ;;  %s116_s4 = inlined_call_operand.vmem [shape: f32[5,128], index: 4, kind: output, shape index: {}]  }
   0x1   :  { %v68_v0 = vld [vmem:[%s112_s1] sm:$0xff]  ;;  %70 = vset.pattern.permute.xlu0 %v71_v1 }
   0x2   :  { %v44_v2 = vld [vmem:[%s113_s2] sm:$0x1f]  ;;  %38 = vmatpush.bf16.msra.mxu0 %v68_v0 }
   0x3   :  { %47 = vperm.xlu0 %70, %v44_v2   ;;  %v18_v3 = vld [vmem:[%s114_s0] sm:$0x7] }
   0x4   :  { %v51_v4 = vld [vmem:[%s115_s3] sm:$0x1f] }
   0x5   :  { %67 = vmatmul.msk.bf16.vlgmr.msra.gmra.mxu0 %vm27_vm0, %v18_v3 }
   0xb   :  { %54 = vperm.xlu0 %70, %v51_v4  }
  0x75   :  { %v48_v5 = vpop.permute.xlu0 %47 }
  0x7d   :  { %v55_v8 = vpop.permute.xlu0 %54 }
  0x82   :  { %v40_v6 = vpop.f32.mrf.mxu0 }
  0x83   :  { %v50_v7 = vmul.f32 %v48_v5, %v40_v6 }
  0x85   :  { %v57_v9 = vadd.f32 %v55_v8, %v50_v7 }
  0x87   :  { %58 = vst [vmem:[%s116_s4] sm:$0x1f] %v57_v9 }
  0x8a   :  { %v42_v10 = vpop.f32.mrf.mxu0 }

// kernel: deeplab_forward.29
= control target key start
LH: loop header
LB: loop body
LE: loop exit
PB: predicated region body
PF: predicated region fallthrough
CT: control target
= control target key end

     0   :  { %vm211_vm0 = vcmask 523264   ;;  %s799_s0 = inlined_call_operand.vmem [shape: bf16[64,1024], index: 0, kind: input, shape index: {}]   ;;  %s800_s1 = inlined_call_operand.vmem [shape: bf16[10,64], index: 1, kind: input, shape index: {}]   ;;  %s801_s2 = inlined_call_operand.vmem [shape: f32[10,1024], index: 2, kind: output, shape index: {}]  }
   0x1   :  { %v449_v0 = vld [vmem:[%s799_s0 + $0xc0] sm:$0xf]  ;;  %v512_v2 = vld [vmem:[%s799_s0 + $0xc4] sm:$0xf]  ;;  %v457_v5 = vld [vmem:[%s799_s0 + $0xc8] sm:$0xf] }
   0x2   :  { %v516_v1 = vld [vmem:[%s799_s0 + $0xdc] sm:$0xf0]  ;;  %v451_v4 = vld [vmem:[%s799_s0 + $0xe0] sm:$0xf0]  ;;  %v517_v6 = vld [vmem:[%s799_s0 + $0xe4] sm:$0xf0] }
   0x3   :  { %v450_v3 = vor.u32 %v516_v1, %v449_v0  ;;  %v454_v7 = vor.u32 %v512_v2, %v451_v4  ;;  %v458_v8 = vor.u32 %v517_v6, %v457_v5  ;;  %v513_v9 = vld [vmem:[%s799_s0 + $0xcc] sm:$0xf]  ;;  %v417_v11 = vld [vmem:[%s799_s0 + $0x80] sm:$0xf]  ;;  %v504_v14 = vld [vmem:[%s799_s0 + $0x84] sm:$0xf] }
   0x4   :  { %v459_v10 = vld [vmem:[%s799_s0 + $0xe8] sm:$0xf0]  ;;  %v508_v13 = vld [vmem:[%s799_s0 + $0x9c] sm:$0xf0]  ;;  %v419_v15 = vld [vmem:[%s799_s0 + $0xa0] sm:$0xf0] }
   0x5   :  { %219 = vmatpush.bf16.msra.mxu0 %v450_v3  ;;  %v462_v12 = vor.u32 %v513_v9, %v459_v10  ;;  %233 = vmatpush.bf16.msra.mxu1 %v454_v7  ;;  %v418_v16 = vor.u32 %v508_v13, %v417_v11  ;;  %v422_v17 = vor.u32 %v504_v14, %v419_v15  ;;  %v425_v18 = vld [vmem:[%s799_s0 + $0x88] sm:$0xf]  ;;  %v505_v20 = vld [vmem:[%s799_s0 + $0x8c] sm:$0xf]  ;;  %v385_v23 = vld [vmem:[%s799_s0 + $0x40] sm:$0xf] }
   0x6   :  { %247 = vmatpush.bf16.msra.mxu2 %v458_v8  ;;  %v509_v19 = vld [vmem:[%s799_s0 + $0xa4] sm:$0xf0]  ;;  %v427_v22 = vld [vmem:[%s799_s0 + $0xa8] sm:$0xf0]  ;;  %v500_v24 = vld [vmem:[%s799_s0 + $0x5c] sm:$0xf0] }
   0x7   :  { %261 = vmatpush.bf16.msra.mxu3 %v462_v12  ;;  %v426_v21 = vor.u32 %v509_v19, %v425_v18  ;;  %v430_v25 = vor.u32 %v505_v20, %v427_v22  ;;  %v496_v26 = vld [vmem:[%s799_s0 + $0x44] sm:$0xf]  ;;  %v393_v28 = vld [vmem:[%s799_s0 + $0x48] sm:$0xf]  ;;  %v386_v29 = vor.u32 %v500_v24, %v385_v23  ;;  %v497_v31 = vld [vmem:[%s799_s0 + $0x4c] sm:$0xf] }
   0x8   :  { %v387_v27 = vld [vmem:[%s799_s0 + $0x60] sm:$0xf0]  ;;  %v501_v30 = vld [vmem:[%s799_s0 + $0x64] sm:$0xf0]  ;;  %v395_v32 = vld [vmem:[%s799_s0 + $0x68] sm:$0xf0] }
   0x9   :  { %220 = vmatpush.bf16.msra.mxu0 %v418_v16  ;;  %234 = vmatpush.bf16.msra.mxu1 %v422_v17  ;;  %v390_v33 = vor.u32 %v496_v26, %v387_v27  ;;  %v394_v34 = vor.u32 %v501_v30, %v393_v28  ;;  %v353_v35 = vld [vmem:[%s799_s0] sm:$0xf]  ;;  %v488_v37 = vld [vmem:[%s799_s0 + $0x4] sm:$0xf]  ;;  %v398_v38 = vor.u32 %v497_v31, %v395_v32  ;;  %v361_v40 = vld [vmem:[%s799_s0 + $0x8] sm:$0xf] }
   0xa   :  { %248 = vmatpush.bf16.msra.mxu2 %v426_v21  ;;  %v492_v36 = vld [vmem:[%s799_s0 + $0x1c] sm:$0xf0]  ;;  %v355_v39 = vld [vmem:[%s799_s0 + $0x20] sm:$0xf0]  ;;  %v493_v41 = vld [vmem:[%s799_s0 + $0x24] sm:$0xf0] }
   0xb   :  { %262 = vmatpush.bf16.msra.mxu3 %v430_v25  ;;  %v489_v42 = vld [vmem:[%s799_s0 + $0xc] sm:$0xf]  ;;  %v349_v44 = vld [vmem:[%s800_s1] sm:$0xf]  ;;  %v354_v45 = vor.u32 %v492_v36, %v353_v35  ;;  %v487_v46 = vld [vmem:[%s800_s1] sm:$0x10]  ;;  %v358_v49 = vor.u32 %v488_v37, %v355_v39  ;;  %v362_v50 = vor.u32 %v493_v41, %v361_v40 }
   0xc   :  { %v363_v43 = vld [vmem:[%s799_s0 + $0x28] sm:$0xf0]  ;;  %v473_v47 = vld [vmem:[%s799_s0 + $0xd8] sm:$0xf]  ;;  %v515_v51 = vld [vmem:[%s799_s0 + $0xdc] sm:$0xf]  ;;  %v658_v58 = vor.u32 %v487_v46, %v349_v44 }
   0xd   :  { %221 = vmatpush.bf16.msra.mxu0 %v386_v29  ;;  %v519_v48 = vld [vmem:[%s799_s0 + $0xf4] sm:$0xf0]  ;;  %235 = vmatpush.bf16.msra.mxu1 %v390_v33  ;;  %v475_v52 = vld [vmem:[%s799_s0 + $0xf8] sm:$0xf0]  ;;  %v366_v53 = vor.u32 %v489_v42, %v363_v43  ;;  %v465_v55 = vld [vmem:[%s799_s0 + $0xd0] sm:$0xf] }
   0xe   :  { %249 = vmatpush.bf16.msra.mxu2 %v394_v34  ;;  %v474_v54 = vor.u32 %v519_v48, %v473_v47  ;;  %v518_v56 = vld [vmem:[%s799_s0 + $0xec] sm:$0xf0]  ;;  %v514_v57 = vld [vmem:[%s799_s0 + $0xd4] sm:$0xf]  ;;  %v478_v59 = vor.u32 %v515_v51, %v475_v52  ;;  %v441_v61 = vld [vmem:[%s799_s0 + $0x98] sm:$0xf] }
   0xf   :  { %263 = vmatpush.bf16.msra.mxu3 %v398_v38  ;;  %v467_v60 = vld [vmem:[%s799_s0 + $0xf0] sm:$0xf0]  ;;  %v511_v62 = vld [vmem:[%s799_s0 + $0xb4] sm:$0xf0]  ;;  %v507_v63 = vld [vmem:[%s799_s0 + $0x9c] sm:$0xf]  ;;  %v466_v1 = vor.u32 %v518_v56, %v465_v55 }
  0x10   :  { %v443_v0 = vld [vmem:[%s799_s0 + $0xb8] sm:$0xf0]  ;;  %v470_v2 = vor.u32 %v514_v57, %v467_v60  ;;  %v442_v3 = vor.u32 %v511_v62, %v441_v61  ;;  %v433_v4 = vld [vmem:[%s799_s0 + $0x90] sm:$0xf]  ;;  %v506_v6 = vld [vmem:[%s799_s0 + $0x94] sm:$0xf] }
  0x11   :  { %222 = vmatpush.bf16.msra.mxu0 %v354_v45  ;;  %236 = vmatpush.bf16.msra.mxu1 %v358_v49  ;;  %v510_v5 = vld [vmem:[%s799_s0 + $0xac] sm:$0xf0]  ;;  %v446_v7 = vor.u32 %v507_v63, %v443_v0  ;;  %v435_v8 = vld [vmem:[%s799_s0 + $0xb0] sm:$0xf0]  ;;  %v409_v9 = vld [vmem:[%s799_s0 + $0x58] sm:$0xf] }
  0x12   :  { %250 = vmatpush.bf16.msra.mxu2 %v362_v50  ;;  %v503_v10 = vld [vmem:[%s799_s0 + $0x74] sm:$0xf0]  ;;  %v499_v11 = vld [vmem:[%s799_s0 + $0x5c] sm:$0xf]  ;;  %v434_v13 = vor.u32 %v510_v5, %v433_v4  ;;  %v438_v14 = vor.u32 %v506_v6, %v435_v8  ;;  %v401_v16 = vld [vmem:[%s799_s0 + $0x50] sm:$0xf] }
  0x13   :  { %264 = vmatpush.bf16.msra.mxu3 %v366_v53  ;;  %v411_v12 = vld [vmem:[%s799_s0 + $0x78] sm:$0xf0]  ;;  %v410_v15 = vor.u32 %v503_v10, %v409_v9  ;;  %v502_v17 = vld [vmem:[%s799_s0 + $0x6c] sm:$0xf0]  ;;  %v498_v18 = vld [vmem:[%s799_s0 + $0x54] sm:$0xf] }
  0x14   :  { %479 = vmatmul.msk.bf16.vlgmr.msra.gmra.mxu0 %vm211_vm0, %v658_v58  ;;  %480 = vmatmul.msk.bf16.vlgmr.msra.gmra.mxu1 %vm211_vm0, %v658_v58  ;;  %v414_v19 = vor.u32 %v499_v11, %v411_v12  ;;  %v403_v20 = vld [vmem:[%s799_s0 + $0x70] sm:$0xf0]  ;;  %v377_v21 = vld [vmem:[%s799_s0 + $0x18] sm:$0xf]  ;;  %v491_v23 = vld [vmem:[%s799_s0 + $0x1c] sm:$0xf]  ;;  %v402_v25 = vor.u32 %v502_v17, %v401_v16 }
  0x15   :  { %481 = vmatmul.msk.bf16.vlgmr.msra.gmra.mxu2 %vm211_vm0, %v658_v58  ;;  %275 = vmatpush.bf16.msrb.mxu0 %v466_v1  ;;  %v495_v22 = vld [vmem:[%s799_s0 + $0x34] sm:$0xf0]  ;;  %v379_v24 = vld [vmem:[%s799_s0 + $0x38] sm:$0xf0]  ;;  %v406_v26 = vor.u32 %v498_v18, %v403_v20  ;;  %v369_v28 = vld [vmem:[%s799_s0 + $0x10] sm:$0xf] }
  0x16   :  { %303 = vmatpush.bf16.msrb.mxu2 %v474_v54  ;;  %482 = vmatmul.msk.bf16.vlgmr.msra.gmra.mxu3 %vm211_vm0, %v658_v58  ;;  %v378_v27 = vor.u32 %v495_v22, %v377_v21  ;;  %v494_v29 = vld [vmem:[%s799_s0 + $0x2c] sm:$0xf0]  ;;  %v382_v30 = vor.u32 %v491_v23, %v379_v24  ;;  %v490_v31 = vld [vmem:[%s799_s0 + $0x14] sm:$0xf] }
  0x17   :  { %317 = vmatpush.bf16.msrb.mxu3 %v478_v59  ;;  %289 = vmatpush.bf16.msrb.mxu1 %v470_v2  ;;  %v371_v32 = vld [vmem:[%s799_s0 + $0x30] sm:$0xf0]  ;;  %v370_v33 = vor.u32 %v494_v29, %v369_v28 }
  0x18   :  { %v374_v34 = vor.u32 %v490_v31, %v371_v32 }
  0x19   :  { %276 = vmatpush.bf16.msrb.mxu0 %v434_v13 }
  0x1a   :  { %304 = vmatpush.bf16.msrb.mxu2 %v442_v3 }
  0x1b   :  { %318 = vmatpush.bf16.msrb.mxu3 %v446_v7  ;;  %290 = vmatpush.bf16.msrb.mxu1 %v438_v14 }
  0x1d   :  { %277 = vmatpush.bf16.msrb.mxu0 %v402_v25 }
  0x1e   :  { %305 = vmatpush.bf16.msrb.mxu2 %v410_v15 }
  0x1f   :  { %319 = vmatpush.bf16.msrb.mxu3 %v414_v19  ;;  %291 = vmatpush.bf16.msrb.mxu1 %v406_v26 }
  0x21   :  { %278 = vmatpush.bf16.msrb.mxu0 %v370_v33 }
  0x22   :  { %306 = vmatpush.bf16.msrb.mxu2 %v378_v27 }
  0x23   :  { %320 = vmatpush.bf16.msrb.mxu3 %v382_v30  ;;  %292 = vmatpush.bf16.msrb.mxu1 %v374_v34 }
  0x24   :  { %483 = vmatmul.msk.bf16.vlgmr.msrb.gmra.mxu0 %vm211_vm0, %v658_v58 }
  0x25   :  { %485 = vmatmul.msk.bf16.vlgmr.msrb.gmra.mxu2 %vm211_vm0, %v658_v58 }
  0x26   :  { %484 = vmatmul.msk.bf16.vlgmr.msrb.gmra.mxu1 %vm211_vm0, %v658_v58  ;;  %486 = vmatmul.msk.bf16.vlgmr.msrb.gmra.mxu3 %vm211_vm0, %v658_v58 }
  0x91   :  { %v224_v35 = vpop.f32.mrf.mxu0  ;;  %v238_v36 = vpop.f32.mrf.mxu1 }
  0x92   :  { %327 = vst [vmem:[%s801_s2] sm:$0xff] %v224_v35 }
  0x93   :  { %328 = vst [vmem:[%s801_s2 + $0x8] sm:$0xff] %v238_v36 }
  0x98   :  { %v252_v37 = vpop.f32.mrf.mxu2 }
  0x99   :  { %329 = vst [vmem:[%s801_s2 + $0x10] sm:$0xff] %v252_v37  ;;  %v266_v38 = vpop.f32.mrf.mxu3  ;;  %v226_v39 = vpop.f32.mrf.mxu0 }
  0x9a   :  { %330 = vst [vmem:[%s801_s2 + $0x18] sm:$0xff] %v266_v38  ;;  %v240_v40 = vpop.f32.mrf.mxu1 }
  0x9b   :  { %335 = vst [vmem:[%s801_s2 + $0x40] sm:$0x3] %v226_v39 }
  0x9c   :  { %336 = vst [vmem:[%s801_s2 + $0x48] sm:$0x3] %v240_v40 }
  0xa0   :  { %v254_v41 = vpop.f32.mrf.mxu2 }
  0xa1   :  { %337 = vst [vmem:[%s801_s2 + $0x50] sm:$0x3] %v254_v41  ;;  %v268_v42 = vpop.f32.mrf.mxu3  ;;  %v280_v43 = vpop.f32.mrf.mxu0 }
  0xa2   :  { %338 = vst [vmem:[%s801_s2 + $0x58] sm:$0x3] %v268_v42 }
  0xa3   :  { %331 = vst [vmem:[%s801_s2 + $0x20] sm:$0xff] %v280_v43  ;;  %v294_v44 = vpop.f32.mrf.mxu1 }
  0xa4   :  { %332 = vst [vmem:[%s801_s2 + $0x28] sm:$0xff] %v294_v44 }
  0xa8   :  { %v308_v45 = vpop.f32.mrf.mxu2 }
  0xa9   :  { %333 = vst [vmem:[%s801_s2 + $0x30] sm:$0xff] %v308_v45  ;;  %v322_v46 = vpop.f32.mrf.mxu3  ;;  %v282_v47 = vpop.f32.mrf.mxu0 }
  0xaa   :  { %334 = vst [vmem:[%s801_s2 + $0x38] sm:$0xff] %v322_v46 }
  0xab   :  { %339 = vst [vmem:[%s801_s2 + $0x60] sm:$0x3] %v282_v47  ;;  %v296_v48 = vpop.f32.mrf.mxu1 }
  0xac   :  { %340 = vst [vmem:[%s801_s2 + $0x68] sm:$0x3] %v296_v48 }
  0xb0   :  { %v310_v49 = vpop.f32.mrf.mxu2 }
  0xb1   :  { %341 = vst [vmem:[%s801_s2 + $0x70] sm:$0x3] %v310_v49  ;;  %v324_v50 = vpop.f32.mrf.mxu3 }
  0xb2   :  { %342 = vst [vmem:[%s801_s2 + $0x78] sm:$0x3] %v324_v50 }

</bundles_post_ra>
